<compile_context>
chip_gen: v7x
topology: tpu7x:2x2x1
jax: 0.10.0
libtpu: 0.0.40
codegen_flags: <defaults>
</compile_context>

<pallas_src>
import functools

import jax
import jax.numpy as jnp
from jax import lax
from jax.experimental import pallas as pl
from jax.experimental.pallas import tpu as pltpu


def encoder_layer_kernel(x_ref, mask_ref,
                         wqkv_ref, bqkv_ref, wo_ref, bo_ref,
                         ln1a_ref, ln1b_ref, ln2a_ref, ln2b_ref,
                         wf1_ref, bf1_ref, wf2_ref, bf2_ref,
                         o_ref, ctx_ref, *, n_heads, eps, q_tile):
    _, L, D = x_ref.shape
    dk = D // n_heads
    f32 = jnp.float32
    bf16 = jnp.bfloat16

    x_all = x_ref[0]          # (L, D) f32 - full sequence (K/V path + residual)
    mask = mask_ref[0]        # (1, L) f32 key-padding mask (1 = keep, 0 = pad)

    def layer_norm(v, a, b):
        mean = jnp.mean(v, axis=-1, keepdims=True)
        # PyTorch x.std(-1): Bessel-corrected (divide by D-1), eps added to std.
        var = jnp.sum((v - mean) ** 2, axis=-1, keepdims=True) * (1.0 / (D - 1))
        inv = pl.reciprocal(jnp.sqrt(var) + eps, approx=True)   # EUP, off the VPU path
        return a * (v - mean) * inv + b

    # ---- sublayer 0: pre-norm -> fused-QKV multi-head attention -> residual ----
    y_all = layer_norm(x_all, ln1a_ref[...], ln1b_ref[...])

    if q_tile == L:
        # Single query tile: ONE fused (L, D) x (D, 3D) projection matmul.
        qkv = jnp.dot(y_all.astype(bf16), wqkv_ref[...],
                      preferred_element_type=f32) + bqkv_ref[...]
        q = qkv[:, 0 * D:1 * D]
        k = qkv[:, 1 * D:2 * D]
        v = qkv[:, 2 * D:3 * D]
        x_q = x_all
    else:
        # Query-tiled path (long L): K/V for the whole sequence, Q only for this tile.
        q_start = pl.multiple_of(pl.program_id(1) * q_tile, q_tile)
        x_b = x_ref.at[0]                               # (L, D) ref view, no load
        x_q = x_b[pl.ds(q_start, q_tile), :]            # (q_tile, D)
        y_q = layer_norm(x_q, ln1a_ref[...], ln1b_ref[...])
        kv = jnp.dot(y_all.astype(bf16), wqkv_ref[:, pl.ds(D, 2 * D)],
                     preferred_element_type=f32) + bqkv_ref[:, pl.ds(D, 2 * D)]
        q = jnp.dot(y_q.astype(bf16), wqkv_ref[:, pl.ds(0, D)],
                    preferred_element_type=f32) + bqkv_ref[:, pl.ds(0, D)]
        k = kv[:, :D]
        v = kv[:, D:]

    q = q.astype(bf16)
    k = k.astype(bf16)
    v = v.astype(bf16)

    # Additive mask bias, hoisted out of the head loop (computed once).
    mask_bias = jnp.where(mask == 0.0, f32(-1e9), f32(0.0))       # (1, L)
    scale = f32(1.0 / (dk ** 0.5))

    for h in range(n_heads):                     # static, unrolled head loop
        cols = slice(h * dk, (h + 1) * dk)
        qh = q[:, cols]                          # (q_tile, dk) bf16
        kh = k[:, cols]                          # (L, dk)      bf16
        vh = v[:, cols]                          # (L, dk)      bf16
        # Contract the last dims directly: no explicit kh.T / XLU transpose.
        s = lax.dot_general(qh, kh, (((1,), (1,)), ((), ())),
                            preferred_element_type=f32)           # (q_tile, L) f32
        s = s * scale + mask_bias
        s = s - jnp.max(s, axis=-1, keepdims=True)
        p = jnp.exp(s)
        p = p * pl.reciprocal(jnp.sum(p, axis=-1, keepdims=True), approx=True)
        # Head outputs land in a VMEM slab (no jnp.concatenate relayouts).
        ctx_ref[:, cols] = jnp.dot(p.astype(bf16), vh,
                                   preferred_element_type=f32)

    attn = jnp.dot(ctx_ref[...].astype(bf16), wo_ref[...],
                   preferred_element_type=f32) + bo_ref[...]
    x1 = x_q + attn                              # dropout == identity (inference)

    # ---- sublayer 1: pre-norm -> feed-forward -> residual ----
    y2 = layer_norm(x1, ln2a_ref[...], ln2b_ref[...])
    h1 = jnp.dot(y2.astype(bf16), wf1_ref[...],
                 preferred_element_type=f32) + bf1_ref[...]
    h1 = jnp.maximum(h1, 0.0)
    ff = jnp.dot(h1.astype(bf16), wf2_ref[...],
                 preferred_element_type=f32) + bf2_ref[...]

    o_ref[0] = (x1 + ff).astype(o_ref.dtype)


def _pick_q_tile(L, D):
    # Flash-style query tiling for long sequences: keeps the (q_tile, L) score tile
    # and resident weights inside v7x's 64 MiB VMEM and gives a second TensorCore
    # work at tiny batch.  Requires a lane-aligned D and a sublane-aligned divisor
    # of L; otherwise fall back to a single full-length tile.
    if D % 128 == 0:
        for tq in (512, 256, 128):
            if L > tq and L % tq == 0:
                return tq
    return L


def encoder_layer(x, mask, params, *, n_heads, eps=1e-6, q_tile=None):
    B, L, D = x.shape
    assert D % n_heads == 0
    mask3 = mask.astype(jnp.float32).reshape(B, 1, L)

    if q_tile is None:
        q_tile = _pick_q_tile(L, D)
    assert L % q_tile == 0
    n_q = L // q_tile

    bf16 = jnp.bfloat16
    # Fused QKV weight / bias.  Matmul weights are stored bf16 (halves weight DMA);
    # biases and layernorm params stay f32 (added/used in f32 math).
    wqkv = jnp.concatenate([params["wq"], params["wk"], params["wv"]], axis=1).astype(bf16)
    bqkv = jnp.concatenate([params["bq"], params["bk"], params["bv"]], axis=1)
    ordered = [
        wqkv, bqkv,
        params["wo"].astype(bf16), params["bo"],
        params["ln1a"], params["ln1b"], params["ln2a"], params["ln2b"],
        params["wf1"].astype(bf16), params["bf1"],
        params["wf2"].astype(bf16), params["bf2"],
    ]

    def bcast_spec(arr):      # whole weight resident; same block for every grid step
        nd = arr.ndim
        return pl.BlockSpec(arr.shape, lambda b, qi: (0,) * nd)

    in_specs = [
        pl.BlockSpec((1, L, D), lambda b, qi: (b, 0, 0)),   # x: full sequence (K/V path)
        pl.BlockSpec((1, 1, L), lambda b, qi: (b, 0, 0)),   # key-padding mask
    ] + [bcast_spec(a) for a in ordered]

    kernel = functools.partial(encoder_layer_kernel,
                               n_heads=n_heads, eps=eps, q_tile=q_tile)

    return pl.pallas_call(
        kernel,
        out_shape=jax.ShapeDtypeStruct((B, L, D), x.dtype),
        grid=(B, n_q),
        in_specs=in_specs,
        out_specs=pl.BlockSpec((1, q_tile, D), lambda b, qi: (b, qi, 0)),
        scratch_shapes=[pltpu.VMEM((q_tile, D), jnp.float32)],   # head-output slab
        compiler_params=pltpu.CompilerParams(
            dimension_semantics=("parallel", "parallel"),
            vmem_limit_bytes=64 * 1024 * 1024,
        ),
    )(x, mask3, *ordered)


def encoder_layer_reference(x, mask, params, *, n_heads, eps=1e-6):
    """Pure-JAX f32 reference matching the PyTorch module (dropout = identity)."""
    B, L, D = x.shape
    dk = D // n_heads

    def layer_norm(v, a, b):
        mean = jnp.mean(v, axis=-1, keepdims=True)
        var = jnp.sum((v - mean) ** 2, axis=-1, keepdims=True) / (D - 1)
        return a * (v - mean) / (jnp.sqrt(var) + eps) + b

    y = layer_norm(x, params["ln1a"], params["ln1b"])
    q = y @ params["wq"] + params["bq"]
    k = y @ params["wk"] + params["bk"]
    v = y @ params["wv"] + params["bv"]
    q = q.reshape(B, L, n_heads, dk).transpose(0, 2, 1, 3)
    k = k.reshape(B, L, n_heads, dk).transpose(0, 2, 1, 3)
    v = v.reshape(B, L, n_heads, dk).transpose(0, 2, 1, 3)
    scores = jnp.einsum("bhqd,bhkd->bhqk", q, k) / jnp.sqrt(jnp.float32(dk))
    m = mask.astype(jnp.float32)[:, None, None, :]
    scores = jnp.where(m == 0, -1e9, scores)
    p = jax.nn.softmax(scores, axis=-1)
    attn = jnp.einsum("bhqk,bhkd->bhqd", p, v).transpose(0, 2, 1, 3).reshape(B, L, D)
    attn = attn @ params["wo"] + params["bo"]
    x1 = x + attn
    y2 = layer_norm(x1, params["ln2a"], params["ln2b"])
    ff = jnp.maximum(y2 @ params["wf1"] + params["bf1"], 0.0) @ params["wf2"] + params["bf2"]
    return x1 + ff


def make_params(key, d_model, d_ff):
    keys = jax.random.split(key, 12)
    s_in = 1.0 / jnp.sqrt(jnp.float32(d_model))
    s_ff = 1.0 / jnp.sqrt(jnp.float32(d_ff))
    return {
        "wq": jax.random.normal(keys[0], (d_model, d_model), jnp.float32) * s_in,
        "bq": jax.random.normal(keys[1], (1, d_model), jnp.float32) * 0.01,
        "wk": jax.random.normal(keys[2], (d_model, d_model), jnp.float32) * s_in,
        "bk": jax.random.normal(keys[3], (1, d_model), jnp.float32) * 0.01,
        "wv": jax.random.normal(keys[4], (d_model, d_model), jnp.float32) * s_in,
        "bv": jax.random.normal(keys[5], (1, d_model), jnp.float32) * 0.01,
        "wo": jax.random.normal(keys[6], (d_model, d_model), jnp.float32) * s_in,
        "bo": jax.random.normal(keys[7], (1, d_model), jnp.float32) * 0.01,
        "ln1a": jnp.ones((1, d_model), jnp.float32),
        "ln1b": jnp.zeros((1, d_model), jnp.float32),
        "ln2a": jnp.ones((1, d_model), jnp.float32),
        "ln2b": jnp.zeros((1, d_model), jnp.float32),
        "wf1": jax.random.normal(keys[8], (d_model, d_ff), jnp.float32) * s_in,
        "bf1": jax.random.normal(keys[9], (1, d_ff), jnp.float32) * 0.01,
        "wf2": jax.random.normal(keys[10], (d_ff, d_model), jnp.float32) * s_ff,
        "bf2": jax.random.normal(keys[11], (1, d_model), jnp.float32) * 0.01,
    }


if __name__ == "__main__":
    root = jax.random.PRNGKey(0)
    case_keys = jax.random.split(root, 2)

    def run_case(B, L, D, H, D_FF, case_key):
        k_x, k_p = jax.random.split(case_key)
        x = jax.random.normal(k_x, (B, L, D), jnp.float32)
        # padding mask: last two positions of batch element 1 are padding
        mask = jnp.ones((B, L), jnp.int32).at[1, -2:].set(0)
        params = make_params(k_p, D, D_FF)

        out = jax.block_until_ready(encoder_layer(x, mask, params, n_heads=H))
        ref = encoder_layer_reference(x, mask, params, n_heads=H)
        assert out.shape == (B, L, D)
        # bf16 MXU operands + approx EUP reciprocals vs a pure-f32 reference:
        # compare with a normalized max-error metric instead of 1e-4 allclose.
        err = float(jnp.max(jnp.abs(out - ref)) / (jnp.max(jnp.abs(ref)) + 1e-6))
        assert err < 5e-2, f"normalized max error too large: {err}"

    # small lane-aligned config (single query tile): D % 128 == 0, d_k = 128
    run_case(B=2, L=16, D=256, H=2, D_FF=512, case_key=case_keys[0])
    # longer sequence exercising the flash-style query-tiled grid (q_tile = 128)
    run_case(B=2, L=256, D=256, H=2, D_FF=512, case_key=case_keys[1])

    print("KERNEL_OK")
</pallas_src>

<mosaic_0001>
module attributes {stable_mosaic.version = 11 : i64} {
  func.func @encoder_layer_kernel(%arg0: i32, %arg1: i32, %arg2: memref<1x16x256xf32, #tpu.memory_space<vmem>>, %arg3: memref<1x1x16xf32, #tpu.memory_space<vmem>>, %arg4: memref<256x768xbf16, #tpu.memory_space<vmem>>, %arg5: memref<1x768xf32, #tpu.memory_space<vmem>>, %arg6: memref<256x256xbf16, #tpu.memory_space<vmem>>, %arg7: memref<1x256xf32, #tpu.memory_space<vmem>>, %arg8: memref<1x256xf32, #tpu.memory_space<vmem>>, %arg9: memref<1x256xf32, #tpu.memory_space<vmem>>, %arg10: memref<1x256xf32, #tpu.memory_space<vmem>>, %arg11: memref<1x256xf32, #tpu.memory_space<vmem>>, %arg12: memref<256x512xbf16, #tpu.memory_space<vmem>>, %arg13: memref<1x512xf32, #tpu.memory_space<vmem>>, %arg14: memref<512x256xbf16, #tpu.memory_space<vmem>>, %arg15: memref<1x256xf32, #tpu.memory_space<vmem>>, %arg16: memref<1x16x256xf32, #tpu.memory_space<vmem>>, %arg17: memref<16x256xf32, #tpu.memory_space<vmem>>) attributes {dimension_semantics = [#tpu.dimension_semantics<parallel>, #tpu.dimension_semantics<parallel>], iteration_bounds = array<i64: 2, 1>, scalar_prefetch = 0 : i64, scratch_operands = 1 : i64, tpu.core_type = #tpu.core_type<tc>, window_params = [{transform_indices = @transform_0, window_bounds = array<i64: 1, 16, 256>}, {transform_indices = @transform_1, window_bounds = array<i64: 1, 1, 16>}, {pipeline_mode = #tpu.pipeline_mode<synchronous>, transform_indices = @transform_2, window_bounds = array<i64: 256, 768>}, {pipeline_mode = #tpu.pipeline_mode<synchronous>, transform_indices = @transform_3, window_bounds = array<i64: 1, 768>}, {pipeline_mode = #tpu.pipeline_mode<synchronous>, transform_indices = @transform_4, window_bounds = array<i64: 256, 256>}, {pipeline_mode = #tpu.pipeline_mode<synchronous>, transform_indices = @transform_5, window_bounds = array<i64: 1, 256>}, {pipeline_mode = #tpu.pipeline_mode<synchronous>, transform_indices = @transform_6, window_bounds = array<i64: 1, 256>}, {pipeline_mode = #tpu.pipeline_mode<synchronous>, transform_indices = @transform_7, window_bounds = array<i64: 1, 256>}, {pipeline_mode = #tpu.pipeline_mode<synchronous>, transform_indices = @transform_8, window_bounds = array<i64: 1, 256>}, {pipeline_mode = #tpu.pipeline_mode<synchronous>, transform_indices = @transform_9, window_bounds = array<i64: 1, 256>}, {pipeline_mode = #tpu.pipeline_mode<synchronous>, transform_indices = @transform_10, window_bounds = array<i64: 256, 512>}, {pipeline_mode = #tpu.pipeline_mode<synchronous>, transform_indices = @transform_11, window_bounds = array<i64: 1, 512>}, {pipeline_mode = #tpu.pipeline_mode<synchronous>, transform_indices = @transform_12, window_bounds = array<i64: 512, 256>}, {pipeline_mode = #tpu.pipeline_mode<synchronous>, transform_indices = @transform_13, window_bounds = array<i64: 1, 256>}, {transform_indices = @transform_14, window_bounds = array<i64: 1, 16, 256>}]} {
    %c0 = arith.constant 0 : index
    %c0_0 = arith.constant 0 : index
    %c0_1 = arith.constant 0 : index
    %0 = vector.load %arg2[%c0, %c0_0, %c0_1] : memref<1x16x256xf32, #tpu.memory_space<vmem>>, vector<1x16x256xf32>
    %1 = vector.shape_cast %0 : vector<1x16x256xf32> to vector<16x256xf32>
    %c0_2 = arith.constant 0 : index
    %c0_3 = arith.constant 0 : index
    %c0_4 = arith.constant 0 : index
    %2 = vector.load %arg3[%c0_2, %c0_3, %c0_4] : memref<1x1x16xf32, #tpu.memory_space<vmem>>, vector<1x1x16xf32>
    %3 = vector.shape_cast %2 : vector<1x1x16xf32> to vector<1x16xf32>
    %c0_5 = arith.constant 0 : index
    %c0_6 = arith.constant 0 : index
    %4 = vector.load %arg8[%c0_5, %c0_6] : memref<1x256xf32, #tpu.memory_space<vmem>>, vector<1x256xf32>
    %c0_7 = arith.constant 0 : index
    %c0_8 = arith.constant 0 : index
    %5 = vector.load %arg9[%c0_7, %c0_8] : memref<1x256xf32, #tpu.memory_space<vmem>>, vector<1x256xf32>
    %cst = arith.constant dense<0.000000e+00> : vector<16xf32>
    %6 = vector.multi_reduction <add>, %1, %cst [1] : vector<16x256xf32> to vector<16xf32>
    %7 = vector.shape_cast %6 : vector<16xf32> to vector<16x1xf32>
    %cst_9 = arith.constant 2.560000e+02 : f32
    %8 = vector.broadcast %cst_9 : f32 to vector<16x1xf32>
    %9 = arith.divf %7, %8 : vector<16x1xf32>
    %10 = vector.broadcast %9 : vector<16x1xf32> to vector<16x256xf32>
    %11 = arith.subf %1, %10 : vector<16x256xf32>
    %12 = arith.mulf %11, %11 : vector<16x256xf32>
    %cst_10 = arith.constant dense<0.000000e+00> : vector<16xf32>
    %13 = vector.multi_reduction <add>, %12, %cst_10 [1] : vector<16x256xf32> to vector<16xf32>
    %14 = vector.shape_cast %13 : vector<16xf32> to vector<16x1xf32>
    %cst_11 = arith.constant 0.00392156886 : f32
    %15 = vector.broadcast %cst_11 : f32 to vector<16x1xf32>
    %16 = arith.mulf %14, %15 : vector<16x1xf32>
    %17 = math.sqrt %16 : vector<16x1xf32>
    %cst_12 = arith.constant 9.99999997E-7 : f32
    %18 = vector.broadcast %cst_12 : f32 to vector<16x1xf32>
    %19 = arith.addf %17, %18 : vector<16x1xf32>
    %20 = tpu.reciprocal %19 {approx = true} : vector<16x1xf32> -> vector<16x1xf32>
    %21 = vector.broadcast %9 : vector<16x1xf32> to vector<16x256xf32>
    %22 = arith.subf %1, %21 : vector<16x256xf32>
    %23 = vector.broadcast %4 : vector<1x256xf32> to vector<16x256xf32>
    %24 = arith.mulf %23, %22 : vector<16x256xf32>
    %25 = vector.broadcast %20 : vector<16x1xf32> to vector<16x256xf32>
    %26 = arith.mulf %24, %25 : vector<16x256xf32>
    %27 = vector.broadcast %5 : vector<1x256xf32> to vector<16x256xf32>
    %28 = arith.addf %26, %27 : vector<16x256xf32>
    %29 = arith.truncf %28 : vector<16x256xf32> to vector<16x256xbf16>
    %c0_13 = arith.constant 0 : index
    %c0_14 = arith.constant 0 : index
    %30 = vector.load %arg4[%c0_13, %c0_14] : memref<256x768xbf16, #tpu.memory_space<vmem>>, vector<256x768xbf16>
    %cst_15 = arith.constant dense<0.000000e+00> : vector<16x768xf32>
    %31 = tpu.matmul %29, %30, %cst_15 {dimension_numbers = #tpu.dot_dimension_numbers<[1], [0], [0], [1], [0, 0, 1, 1], [], []>} : vector<16x256xbf16>, vector<256x768xbf16>, vector<16x768xf32> -> vector<16x768xf32>
    %c0_16 = arith.constant 0 : index
    %c0_17 = arith.constant 0 : index
    %32 = vector.load %arg5[%c0_16, %c0_17] : memref<1x768xf32, #tpu.memory_space<vmem>>, vector<1x768xf32>
    %33 = vector.broadcast %32 : vector<1x768xf32> to vector<16x768xf32>
    %34 = arith.addf %31, %33 : vector<16x768xf32>
    %35 = vector.extract_strided_slice %34 {offsets = [0, 0], sizes = [16, 256], strides = [1, 1]} : vector<16x768xf32> to vector<16x256xf32>
    %36 = vector.extract_strided_slice %34 {offsets = [0, 256], sizes = [16, 256], strides = [1, 1]} : vector<16x768xf32> to vector<16x256xf32>
    %37 = vector.extract_strided_slice %34 {offsets = [0, 512], sizes = [16, 256], strides = [1, 1]} : vector<16x768xf32> to vector<16x256xf32>
    %38 = arith.truncf %35 : vector<16x256xf32> to vector<16x256xbf16>
    %39 = arith.truncf %36 : vector<16x256xf32> to vector<16x256xbf16>
    %40 = arith.truncf %37 : vector<16x256xf32> to vector<16x256xbf16>
    %cst_18 = arith.constant 0.000000e+00 : f32
    %41 = vector.broadcast %cst_18 : f32 to vector<1x16xf32>
    %42 = arith.cmpf oeq, %3, %41 : vector<1x16xf32>
    %cst_19 = arith.constant -1.000000e+09 : f32
    %cst_20 = arith.constant 0.000000e+00 : f32
    %43 = vector.broadcast %cst_19 : f32 to vector<1x16xf32>
    %44 = vector.broadcast %cst_20 : f32 to vector<1x16xf32>
    %45 = arith.select %42, %43, %44 : vector<1x16xi1>, vector<1x16xf32>
    %46 = vector.extract_strided_slice %38 {offsets = [0, 0], sizes = [16, 128], strides = [1, 1]} : vector<16x256xbf16> to vector<16x128xbf16>
    %47 = vector.extract_strided_slice %39 {offsets = [0, 0], sizes = [16, 128], strides = [1, 1]} : vector<16x256xbf16> to vector<16x128xbf16>
    %48 = vector.extract_strided_slice %40 {offsets = [0, 0], sizes = [16, 128], strides = [1, 1]} : vector<16x256xbf16> to vector<16x128xbf16>
    %cst_21 = arith.constant dense<0.000000e+00> : vector<16x16xf32>
    %49 = tpu.matmul %46, %47, %cst_21 {dimension_numbers = #tpu.dot_dimension_numbers<[1], [1], [0], [0], [0, 0, 1, 0], [], []>} : vector<16x128xbf16>, vector<16x128xbf16>, vector<16x16xf32> -> vector<16x16xf32>
    %cst_22 = arith.constant 0.0883883461 : f32
    %50 = vector.broadcast %cst_22 : f32 to vector<16x16xf32>
    %51 = arith.mulf %49, %50 : vector<16x16xf32>
    %52 = vector.broadcast %45 : vector<1x16xf32> to vector<16x16xf32>
    %53 = arith.addf %51, %52 : vector<16x16xf32>
    %cst_23 = arith.constant dense<0xFF800000> : vector<16xf32>
    %54 = vector.multi_reduction <maximumf>, %53, %cst_23 [1] : vector<16x16xf32> to vector<16xf32>
    %55 = vector.shape_cast %54 : vector<16xf32> to vector<16x1xf32>
    %56 = vector.broadcast %55 : vector<16x1xf32> to vector<16x16xf32>
    %57 = arith.subf %53, %56 : vector<16x16xf32>
    %58 = math.exp %57 : vector<16x16xf32>
    %cst_24 = arith.constant dense<0.000000e+00> : vector<16xf32>
    %59 = vector.multi_reduction <add>, %58, %cst_24 [1] : vector<16x16xf32> to vector<16xf32>
    %60 = vector.shape_cast %59 : vector<16xf32> to vector<16x1xf32>
    %61 = tpu.reciprocal %60 {approx = true} : vector<16x1xf32> -> vector<16x1xf32>
    %62 = vector.broadcast %61 : vector<16x1xf32> to vector<16x16xf32>
    %63 = arith.mulf %58, %62 : vector<16x16xf32>
    %64 = arith.truncf %63 : vector<16x16xf32> to vector<16x16xbf16>
    %cst_25 = arith.constant dense<0.000000e+00> : vector<16x128xf32>
    %65 = tpu.matmul %64, %48, %cst_25 {dimension_numbers = #tpu.dot_dimension_numbers<[1], [0], [0], [1], [0, 0, 1, 1], [], []>} : vector<16x16xbf16>, vector<16x128xbf16>, vector<16x128xf32> -> vector<16x128xf32>
    %c0_26 = arith.constant 0 : index
    %c0_27 = arith.constant 0 : index
    %66 = vector.load %arg17[%c0_26, %c0_27] : memref<16x256xf32, #tpu.memory_space<vmem>>, vector<16x128xf32>
    tpu.vector_store %arg17[%c0_26, %c0_27], %65 {strides = array<i32>} : memref<16x256xf32, #tpu.memory_space<vmem>>, vector<16x128xf32>,
    %67 = vector.extract_strided_slice %38 {offsets = [0, 128], sizes = [16, 128], strides = [1, 1]} : vector<16x256xbf16> to vector<16x128xbf16>
    %68 = vector.extract_strided_slice %39 {offsets = [0, 128], sizes = [16, 128], strides = [1, 1]} : vector<16x256xbf16> to vector<16x128xbf16>
    %69 = vector.extract_strided_slice %40 {offsets = [0, 128], sizes = [16, 128], strides = [1, 1]} : vector<16x256xbf16> to vector<16x128xbf16>
    %cst_28 = arith.constant dense<0.000000e+00> : vector<16x16xf32>
    %70 = tpu.matmul %67, %68, %cst_28 {dimension_numbers = #tpu.dot_dimension_numbers<[1], [1], [0], [0], [0, 0, 1, 0], [], []>} : vector<16x128xbf16>, vector<16x128xbf16>, vector<16x16xf32> -> vector<16x16xf32>
    %cst_29 = arith.constant 0.0883883461 : f32
    %71 = vector.broadcast %cst_29 : f32 to vector<16x16xf32>
    %72 = arith.mulf %70, %71 : vector<16x16xf32>
    %73 = vector.broadcast %45 : vector<1x16xf32> to vector<16x16xf32>
    %74 = arith.addf %72, %73 : vector<16x16xf32>
    %cst_30 = arith.constant dense<0xFF800000> : vector<16xf32>
    %75 = vector.multi_reduction <maximumf>, %74, %cst_30 [1] : vector<16x16xf32> to vector<16xf32>
    %76 = vector.shape_cast %75 : vector<16xf32> to vector<16x1xf32>
    %77 = vector.broadcast %76 : vector<16x1xf32> to vector<16x16xf32>
    %78 = arith.subf %74, %77 : vector<16x16xf32>
    %79 = math.exp %78 : vector<16x16xf32>
    %cst_31 = arith.constant dense<0.000000e+00> : vector<16xf32>
    %80 = vector.multi_reduction <add>, %79, %cst_31 [1] : vector<16x16xf32> to vector<16xf32>
    %81 = vector.shape_cast %80 : vector<16xf32> to vector<16x1xf32>
    %82 = tpu.reciprocal %81 {approx = true} : vector<16x1xf32> -> vector<16x1xf32>
    %83 = vector.broadcast %82 : vector<16x1xf32> to vector<16x16xf32>
    %84 = arith.mulf %79, %83 : vector<16x16xf32>
    %85 = arith.truncf %84 : vector<16x16xf32> to vector<16x16xbf16>
    %cst_32 = arith.constant dense<0.000000e+00> : vector<16x128xf32>
    %86 = tpu.matmul %85, %69, %cst_32 {dimension_numbers = #tpu.dot_dimension_numbers<[1], [0], [0], [1], [0, 0, 1, 1], [], []>} : vector<16x16xbf16>, vector<16x128xbf16>, vector<16x128xf32> -> vector<16x128xf32>
    %c0_33 = arith.constant 0 : index
    %c128 = arith.constant 128 : index
    %87 = vector.load %arg17[%c0_33, %c128] : memref<16x256xf32, #tpu.memory_space<vmem>>, vector<16x128xf32>
    tpu.vector_store %arg17[%c0_33, %c128], %86 {strides = array<i32>} : memref<16x256xf32, #tpu.memory_space<vmem>>, vector<16x128xf32>,
    %c0_34 = arith.constant 0 : index
    %c0_35 = arith.constant 0 : index
    %88 = vector.load %arg17[%c0_34, %c0_35] : memref<16x256xf32, #tpu.memory_space<vmem>>, vector<16x256xf32>
    %89 = arith.truncf %88 : vector<16x256xf32> to vector<16x256xbf16>
    %c0_36 = arith.constant 0 : index
    %c0_37 = arith.constant 0 : index
    %90 = vector.load %arg6[%c0_36, %c0_37] : memref<256x256xbf16, #tpu.memory_space<vmem>>, vector<256x256xbf16>
    %cst_38 = arith.constant dense<0.000000e+00> : vector<16x256xf32>
    %91 = tpu.matmul %89, %90, %cst_38 {dimension_numbers = #tpu.dot_dimension_numbers<[1], [0], [0], [1], [0, 0, 1, 1], [], []>} : vector<16x256xbf16>, vector<256x256xbf16>, vector<16x256xf32> -> vector<16x256xf32>
    %c0_39 = arith.constant 0 : index
    %c0_40 = arith.constant 0 : index
    %92 = vector.load %arg7[%c0_39, %c0_40] : memref<1x256xf32, #tpu.memory_space<vmem>>, vector<1x256xf32>
    %93 = vector.broadcast %92 : vector<1x256xf32> to vector<16x256xf32>
    %94 = arith.addf %91, %93 : vector<16x256xf32>
    %95 = arith.addf %1, %94 : vector<16x256xf32>
    %c0_41 = arith.constant 0 : index
    %c0_42 = arith.constant 0 : index
    %96 = vector.load %arg10[%c0_41, %c0_42] : memref<1x256xf32, #tpu.memory_space<vmem>>, vector<1x256xf32>
    %c0_43 = arith.constant 0 : index
    %c0_44 = arith.constant 0 : index
    %97 = vector.load %arg11[%c0_43, %c0_44] : memref<1x256xf32, #tpu.memory_space<vmem>>, vector<1x256xf32>
    %cst_45 = arith.constant dense<0.000000e+00> : vector<16xf32>
    %98 = vector.multi_reduction <add>, %95, %cst_45 [1] : vector<16x256xf32> to vector<16xf32>
    %99 = vector.shape_cast %98 : vector<16xf32> to vector<16x1xf32>
    %cst_46 = arith.constant 2.560000e+02 : f32
    %100 = vector.broadcast %cst_46 : f32 to vector<16x1xf32>
    %101 = arith.divf %99, %100 : vector<16x1xf32>
    %102 = vector.broadcast %101 : vector<16x1xf32> to vector<16x256xf32>
    %103 = arith.subf %95, %102 : vector<16x256xf32>
    %104 = arith.mulf %103, %103 : vector<16x256xf32>
    %cst_47 = arith.constant dense<0.000000e+00> : vector<16xf32>
    %105 = vector.multi_reduction <add>, %104, %cst_47 [1] : vector<16x256xf32> to vector<16xf32>
    %106 = vector.shape_cast %105 : vector<16xf32> to vector<16x1xf32>
    %cst_48 = arith.constant 0.00392156886 : f32
    %107 = vector.broadcast %cst_48 : f32 to vector<16x1xf32>
    %108 = arith.mulf %106, %107 : vector<16x1xf32>
    %109 = math.sqrt %108 : vector<16x1xf32>
    %cst_49 = arith.constant 9.99999997E-7 : f32
    %110 = vector.broadcast %cst_49 : f32 to vector<16x1xf32>
    %111 = arith.addf %109, %110 : vector<16x1xf32>
    %112 = tpu.reciprocal %111 {approx = true} : vector<16x1xf32> -> vector<16x1xf32>
    %113 = vector.broadcast %101 : vector<16x1xf32> to vector<16x256xf32>
    %114 = arith.subf %95, %113 : vector<16x256xf32>
    %115 = vector.broadcast %96 : vector<1x256xf32> to vector<16x256xf32>
    %116 = arith.mulf %115, %114 : vector<16x256xf32>
    %117 = vector.broadcast %112 : vector<16x1xf32> to vector<16x256xf32>
    %118 = arith.mulf %116, %117 : vector<16x256xf32>
    %119 = vector.broadcast %97 : vector<1x256xf32> to vector<16x256xf32>
    %120 = arith.addf %118, %119 : vector<16x256xf32>
    %121 = arith.truncf %120 : vector<16x256xf32> to vector<16x256xbf16>
    %c0_50 = arith.constant 0 : index
    %c0_51 = arith.constant 0 : index
    %122 = vector.load %arg12[%c0_50, %c0_51] : memref<256x512xbf16, #tpu.memory_space<vmem>>, vector<256x512xbf16>
    %cst_52 = arith.constant dense<0.000000e+00> : vector<16x512xf32>
    %123 = tpu.matmul %121, %122, %cst_52 {dimension_numbers = #tpu.dot_dimension_numbers<[1], [0], [0], [1], [0, 0, 1, 1], [], []>} : vector<16x256xbf16>, vector<256x512xbf16>, vector<16x512xf32> -> vector<16x512xf32>
    %c0_53 = arith.constant 0 : index
    %c0_54 = arith.constant 0 : index
    %124 = vector.load %arg13[%c0_53, %c0_54] : memref<1x512xf32, #tpu.memory_space<vmem>>, vector<1x512xf32>
    %125 = vector.broadcast %124 : vector<1x512xf32> to vector<16x512xf32>
    %126 = arith.addf %123, %125 : vector<16x512xf32>
    %cst_55 = arith.constant 0.000000e+00 : f32
    %127 = vector.broadcast %cst_55 : f32 to vector<16x512xf32>
    %128 = arith.maximumf %126, %127 : vector<16x512xf32>
    %129 = arith.truncf %128 : vector<16x512xf32> to vector<16x512xbf16>
    %c0_56 = arith.constant 0 : index
    %c0_57 = arith.constant 0 : index
    %130 = vector.load %arg14[%c0_56, %c0_57] : memref<512x256xbf16, #tpu.memory_space<vmem>>, vector<512x256xbf16>
    %cst_58 = arith.constant dense<0.000000e+00> : vector<16x256xf32>
    %131 = tpu.matmul %129, %130, %cst_58 {dimension_numbers = #tpu.dot_dimension_numbers<[1], [0], [0], [1], [0, 0, 1, 1], [], []>} : vector<16x512xbf16>, vector<512x256xbf16>, vector<16x256xf32> -> vector<16x256xf32>
    %c0_59 = arith.constant 0 : index
    %c0_60 = arith.constant 0 : index
    %132 = vector.load %arg15[%c0_59, %c0_60] : memref<1x256xf32, #tpu.memory_space<vmem>>, vector<1x256xf32>
    %133 = vector.broadcast %132 : vector<1x256xf32> to vector<16x256xf32>
    %134 = arith.addf %131, %133 : vector<16x256xf32>
    %135 = arith.addf %95, %134 : vector<16x256xf32>
    %c0_61 = arith.constant 0 : index
    %c0_62 = arith.constant 0 : index
    %c0_63 = arith.constant 0 : index
    %136 = vector.load %arg16[%c0_61, %c0_62, %c0_63] : memref<1x16x256xf32, #tpu.memory_space<vmem>>, vector<1x16x256xf32>
    %137 = vector.shape_cast %136 : vector<1x16x256xf32> to vector<16x256xf32>
    %138 = vector.shape_cast %135 : vector<16x256xf32> to vector<1x16x256xf32>
    tpu.vector_store %arg16[%c0_61, %c0_62, %c0_63], %138 {strides = array<i32>} : memref<1x16x256xf32, #tpu.memory_space<vmem>>, vector<1x16x256xf32>,
    return
  }
  func.func @transform_0(%arg0: i32, %arg1: i32) -> (i32, i32, i32) {
    %c0_i32 = arith.constant 0 : i32
    %c0_i32_0 = arith.constant 0 : i32
    %c0_i32_1 = arith.constant 0 : i32
    return %arg0, %c0_i32, %c0_i32_0 : i32, i32, i32
  }
  func.func @transform_1(%arg0: i32, %arg1: i32) -> (i32, i32, i32) {
    %c0_i32 = arith.constant 0 : i32
    %c0_i32_0 = arith.constant 0 : i32
    %c0_i32_1 = arith.constant 0 : i32
    return %arg0, %c0_i32, %c0_i32_0 : i32, i32, i32
  }
  func.func @transform_2(%arg0: i32, %arg1: i32) -> (i32, i32) {
    %c0_i32 = arith.constant 0 : i32
    %c0_i32_0 = arith.constant 0 : i32
    %c0_i32_1 = arith.constant 0 : i32
    return %c0_i32, %c0_i32_0 : i32, i32
  }
  func.func @transform_3(%arg0: i32, %arg1: i32) -> (i32, i32) {
    %c0_i32 = arith.constant 0 : i32
    %c0_i32_0 = arith.constant 0 : i32
    %c0_i32_1 = arith.constant 0 : i32
    return %c0_i32, %c0_i32_0 : i32, i32
  }
  func.func @transform_4(%arg0: i32, %arg1: i32) -> (i32, i32) {
    %c0_i32 = arith.constant 0 : i32
    %c0_i32_0 = arith.constant 0 : i32
    %c0_i32_1 = arith.constant 0 : i32
    return %c0_i32, %c0_i32_0 : i32, i32
  }
  func.func @transform_5(%arg0: i32, %arg1: i32) -> (i32, i32) {
    %c0_i32 = arith.constant 0 : i32
    %c0_i32_0 = arith.constant 0 : i32
    %c0_i32_1 = arith.constant 0 : i32
    return %c0_i32, %c0_i32_0 : i32, i32
  }
  func.func @transform_6(%arg0: i32, %arg1: i32) -> (i32, i32) {
    %c0_i32 = arith.constant 0 : i32
    %c0_i32_0 = arith.constant 0 : i32
    %c0_i32_1 = arith.constant 0 : i32
    return %c0_i32, %c0_i32_0 : i32, i32
  }
  func.func @transform_7(%arg0: i32, %arg1: i32) -> (i32, i32) {
    %c0_i32 = arith.constant 0 : i32
    %c0_i32_0 = arith.constant 0 : i32
    %c0_i32_1 = arith.constant 0 : i32
    return %c0_i32, %c0_i32_0 : i32, i32
  }
  func.func @transform_8(%arg0: i32, %arg1: i32) -> (i32, i32) {
    %c0_i32 = arith.constant 0 : i32
    %c0_i32_0 = arith.constant 0 : i32
    %c0_i32_1 = arith.constant 0 : i32
    return %c0_i32, %c0_i32_0 : i32, i32
  }
  func.func @transform_9(%arg0: i32, %arg1: i32) -> (i32, i32) {
    %c0_i32 = arith.constant 0 : i32
    %c0_i32_0 = arith.constant 0 : i32
    %c0_i32_1 = arith.constant 0 : i32
    return %c0_i32, %c0_i32_0 : i32, i32
  }
  func.func @transform_10(%arg0: i32, %arg1: i32) -> (i32, i32) {
    %c0_i32 = arith.constant 0 : i32
    %c0_i32_0 = arith.constant 0 : i32
    %c0_i32_1 = arith.constant 0 : i32
    return %c0_i32, %c0_i32_0 : i32, i32
  }
  func.func @transform_11(%arg0: i32, %arg1: i32) -> (i32, i32) {
    %c0_i32 = arith.constant 0 : i32
    %c0_i32_0 = arith.constant 0 : i32
    %c0_i32_1 = arith.constant 0 : i32
    return %c0_i32, %c0_i32_0 : i32, i32
  }
  func.func @transform_12(%arg0: i32, %arg1: i32) -> (i32, i32) {
    %c0_i32 = arith.constant 0 : i32
    %c0_i32_0 = arith.constant 0 : i32
    %c0_i32_1 = arith.constant 0 : i32
    return %c0_i32, %c0_i32_0 : i32, i32
  }
  func.func @transform_13(%arg0: i32, %arg1: i32) -> (i32, i32) {
    %c0_i32 = arith.constant 0 : i32
    %c0_i32_0 = arith.constant 0 : i32
    %c0_i32_1 = arith.constant 0 : i32
    return %c0_i32, %c0_i32_0 : i32, i32
  }
  func.func @transform_14(%arg0: i32, %arg1: i32) -> (i32, i32, i32) {
    %c0_i32 = arith.constant 0 : i32
    %c0_i32_0 = arith.constant 0 : i32
    return %arg0, %arg1, %c0_i32 : i32, i32, i32
  }
}

</mosaic_0001>

<bundles_post_ra>
// kernel: tpu_custom_call.1
= control target key start
LH: loop header
LB: loop body
LE: loop exit
PB: predicated region body
PF: predicated region fallthrough
CT: control target
= control target key end

     0   :  { %s5548_s0 = inlined_call_operand.hbm [shape: f32[2,16,256], index: 0, kind: input, shape index: {}]   ;;  %s5549_s1 = inlined_call_operand.hbm [shape: f32[2,1,16], index: 1, kind: input, shape index: {}]   ;;  %s5550_s2 = inlined_call_operand.hbm [shape: bf16[256,768], index: 2, kind: input, shape index: {}]   ;;  %s5551_s3 = inlined_call_operand.hbm [shape: f32[1,768], index: 3, kind: input, shape index: {}]   ;;  %s5552_s4 = inlined_call_operand.hbm [shape: bf16[256,256], index: 4, kind: input, shape index: {}]   ;;  %s5553_s5 = inlined_call_operand.hbm [shape: f32[1,256], index: 5, kind: input, shape index: {}]   ;;  %s5554_s6 = inlined_call_operand.hbm [shape: f32[1,256], index: 6, kind: input, shape index: {}]   ;;  %s5555_s7 = inlined_call_operand.hbm [shape: f32[1,256], index: 7, kind: input, shape index: {}]   ;;  %s5556_s8 = inlined_call_operand.hbm [shape: f32[1,256], index: 8, kind: input, shape index: {}]   ;;  %s5557_s9 = inlined_call_operand.hbm [shape: f32[1,256], index: 9, kind: input, shape index: {}]   ;;  %s5558_s10 = inlined_call_operand.hbm [shape: bf16[256,512], index: 10, kind: input, shape index: {}]   ;;  %s5559_s11 = inlined_call_operand.hbm [shape: f32[1,512], index: 11, kind: input, shape index: {}]   ;;  %s5560_s12 = inlined_call_operand.hbm [shape: bf16[512,256], index: 12, kind: input, shape index: {}]   ;;  %s5561_s13 = inlined_call_operand.hbm [shape: f32[1,256], index: 13, kind: input, shape index: {}]   ;;  %s5562_s14 = inlined_call_operand.hbm [shape: f32[2,16,256], index: 14, kind: output, shape index: {}]  }
   0x1   :  { %5578 = sst [smem:[#allocation42_spill]] %s5548_s0 }
   0x2   :  { %5579 = sst [smem:[#allocation43_spill]] %s5549_s1 }
   0x3   :  { %5580 = sst [smem:[#allocation44_spill]] %s5550_s2 }
   0x4   :  { %5581 = sst [smem:[#allocation45_spill]] %s5551_s3 }
   0x5   :  { %5582 = sst [smem:[#allocation46_spill]] %s5552_s4 }
   0x6   :  { %5583 = sst [smem:[#allocation47_spill]] %s5553_s5 }
   0x7   :  { %5584 = sst [smem:[#allocation48_spill]] %s5554_s6 }
   0x8   :  { %5585 = sst [smem:[#allocation49_spill]] %s5555_s7 }
   0x9   :  { %5586 = sst [smem:[#allocation50_spill]] %s5556_s8 }
   0xa   :  { %5587 = sst [smem:[#allocation51_spill]] %s5562_s14 }
   0xb   :  { %19 = vsyncpa [#allocation4], 0 }
   0xc   :  { %21 = vsyncpa [#allocation4 + $0x1], 0 }
   0xd   :  { %22 = vsyncpa [#allocation7], 0 }
   0xe   :  { %24 = vsyncpa [#allocation7 + $0x1], 0 }
   0xf   :  { %25 = vsyncpa [#allocation10], 0 }
  0x10   :  { %26 = vsyncpa [#allocation13], 0 }
  0x11   :  { %27 = vsyncpa [#allocation16], 0 }
  0x12   :  { %28 = vsyncpa [#allocation19], 0 }
  0x13   :  { %29 = vsyncpa [#allocation22], 0 }
  0x14   :  { %30 = vsyncpa [#allocation25], 0 }
  0x15   :  { %31 = vsyncpa [#allocation5], 0 }
  0x16   :  { %33 = vsyncpa [#allocation5 + $0x1], 0  ;;  %s4896_s29 = smov 0   ;;  %s4898_s30 = smov 0  }
  0x17   :  { %s4900_s15 = smov 0   ;;  %s4902_s16 = smov 0  }
  0x18   :  { %s4904_s17 = smov 0   ;;  %s4906_s18 = smov 0  }
  0x19 LB: > { %5588 = sst [smem:[#allocation37_spill]] %s4774_s29  ;;  %s4927_s19 = sadd.s32 4294967295, %s4794_s18   ;;  %s4794_s18 = sphi %s4906_s18, %s39_s18   ;;  %s4790_s17 = sphi %s4904_s17, %s5650_s17   ;;  %s4786_s16 = sphi %s4902_s16, %s5649_s16   ;;  %s4782_s15 = sphi %s4900_s15, %s5648_s15   ;;  %s4778_s30 = sphi %s4898_s30, %s5647_s30   ;;  %s4774_s29 = sphi %s4896_s29, %s5646_s29  }
  0x1a   : > { %5589 = sst [smem:[#allocation38_spill]] %s4778_s30  ;;  %p3328_p0 = scmp.ge.s32.totalorder %s4794_s18, 1 }
  0x1b   : > { %5590 = sst [smem:[#allocation39_spill]] %s4786_s16  ;;  %p5571_p1 = scmp.eq.s32.totalorder %s4927_s19, 0 }
  0x1c   : > { %5591 = sst [smem:[#allocation40_spill]] %s4927_s19  ;;  %p388_p2 = scmp.lt.s32.totalorder %s4794_s18, 3 }
  0x1d   : > { %s4796_s21 = smov [#allocation8]   ;;  %s4797_s24 = smov [#allocation9]  }
  0x1e   : > { %p4932_p3 = pnand %p3328_p0, %p388_p2  ;;  %s400_s22 = sshll.u32 %s4796_s21, 4  ;;  %s4936_s22 = int_to_ptr.vmem [resolvable:$true] %s400_s22 }
  0x1f   : > { %s414_s25 = sshll.u32 %s4797_s24, 4  ;;  %s4798_s26 = smov [#allocation12]   ;;  %s4947_s25 = int_to_ptr.vmem [resolvable:$true] %s414_s25 }
  0x20   : > { %s5592_s20 = scalar_select %p4932_p3, 1, 0 }
  0x21   : > { %p3720_p4 = pneg %p4932_p3  ;;  %s4949_s27 = sshll.u32 %s4798_s26, 4  ;;  %s439_s27 = int_to_ptr.vmem [resolvable:$true] %s4949_s27 }
  0x22   : > { %5593 = sst [smem:[#allocation41_spill]] %s5592_s20  ;;  %s5595_s2 = sld [smem:[#allocation44_spill]] }
  0x23   : > { %p4943_p6 = pnand %p3720_p4, %p5571_p1 }
  0x25   : > { %p4959_p8 = pneg %p4943_p6 }
  0x28   : > { %s4284_s14 = scalar_lea.hbm %s5595_s2, 12288 }
  0x29   : > { %p4285_p7 = scmp.ne.s32.totalorder %s5595_s2, %s4284_s14  ;;  %p4291_p11 = scmp.lt.u32.totalorder %s4284_s14, %s5595_s2 }
  0x2b   : > { %p4287_p9 = pnand %p4959_p8, %p4285_p7 }
  0x2d   : > { %p4288_p10 = pneg %p4287_p9 }
  0x2f   : > { %p4293_p12 = pnand %p4291_p11, %p4288_p10 }
  0x31   : > { %4296 = shalt.err (!%p4293_p12)
}
  0x32   : > { %s4297_s16 = scalar_lea.vmem %s4936_s22, 12288  ;;  %p4305_p4 = scmp.lt.s32.totalorder %s4936_s22, %s4936_s22 }
  0x33   : > { %p4298_p13 = scmp.ne.s32.totalorder %s4936_s22, %s4297_s16  ;;  %p4306_p5 = scmp.lt.s32.totalorder %s4297_s16, %s4297_s16 }
  0x35   : > { %p4300_p0 = pnand %p4298_p13, %p4959_p8  ;;  %p4307_p7 = por %p4306_p5, %p4305_p4 }
  0x37   : > { %p4301_p2 = pneg %p4300_p0 }
  0x39   : > { %p4308_p9 = pnand %p4307_p7, %p4301_p2 }
  0x3b   : > { %4311 = shalt.err (!%p4308_p9)
}
  0x3c   : > { %s4799_s20 = smov 384   ;;  %s4800_s14 = smov 24  }
  0x3d   : > { %3723 = dma.hbm_to_vmem [thread:$0]  (!%p4943_p6), %s5595_s2, 12288, %s4936_s22, [#allocation7], %s4799_s20, %s4799_s20, %s4800_s14  }
  0x3e   : > { %s5597_s3 = sld [smem:[#allocation45_spill]] }
  0x44   : > { %s4312_s0 = scalar_lea.hbm %s5597_s3, 96 }
  0x45   : > { %p4313_p5 = scmp.ne.s32.totalorder %s5597_s3, %s4312_s0  ;;  %p4319_p12 = scmp.lt.u32.totalorder %s4312_s0, %s5597_s3 }
  0x47   : > { %p4315_p10 = pnand %p4313_p5, %p4959_p8 }
  0x49   : > { %p4316_p11 = pneg %p4315_p10 }
  0x4b   : > { %p4321_p13 = pnand %p4319_p12, %p4316_p11 }
  0x4d   : > { %4324 = shalt.err (!%p4321_p13)
}
  0x4e   : > { %s4325_s22 = scalar_lea.vmem %s4947_s25, 96  ;;  %p4333_p7 = scmp.lt.s32.totalorder %s4947_s25, %s4947_s25 }
  0x4f   : > { %p4326_p0 = scmp.ne.s32.totalorder %s4947_s25, %s4325_s22  ;;  %p4334_p9 = scmp.lt.s32.totalorder %s4325_s22, %s4325_s22 }
  0x51   : > { %p4328_p2 = pnand %p4326_p0, %p4959_p8  ;;  %p4335_p5 = por %p4334_p9, %p4333_p7 }
  0x53   : > { %p4329_p4 = pneg %p4328_p2 }
  0x55   : > { %p4336_p10 = pnand %p4335_p5, %p4329_p4 }
  0x57   : > { %4339 = shalt.err (!%p4336_p10)
}
  0x58   : > { %3726 = dma.hbm_to_vmem [thread:$0]  (!%p4943_p6), %s5597_s3, 96, %s4947_s25, [#allocation10]  }
  0x59   : > { %s5598_s5 = sld [smem:[#allocation47_spill]] }
  0x5f   : > { %s4340_s20 = scalar_lea.hbm %s5598_s5, 32 }
  0x60   : > { %p4341_p11 = scmp.ne.s32.totalorder %s5598_s5, %s4340_s20  ;;  %p4347_p0 = scmp.lt.u32.totalorder %s4340_s20, %s5598_s5 }
  0x62   : > { %p4343_p12 = pnand %p4341_p11, %p4959_p8 }
  0x64   : > { %p4344_p13 = pneg %p4343_p12 }
  0x66   : > { %p4349_p2 = pnand %p4347_p0, %p4344_p13 }
  0x68   : > { %4352 = shalt.err (!%p4349_p2)
}
  0x69   : > { %s4353_s26 = scalar_lea.vmem %s439_s27, 32  ;;  %p4361_p5 = scmp.lt.s32.totalorder %s439_s27, %s439_s27 }
  0x6a   : > { %p4354_p4 = scmp.ne.s32.totalorder %s439_s27, %s4353_s26  ;;  %p4362_p10 = scmp.lt.s32.totalorder %s4353_s26, %s4353_s26 }
  0x6c   : > { %p4356_p7 = pnand %p4354_p4, %p4959_p8  ;;  %p4363_p1 = por %p4362_p10, %p4361_p5 }
  0x6e   : > { %p4357_p9 = pneg %p4356_p7 }
  0x70   : > { %p4364_p3 = pnand %p4363_p1, %p4357_p9 }
  0x72   : > { %4367 = shalt.err (!%p4364_p3)
}
  0x73   : > { %3732 = dma.hbm_to_vmem [thread:$0]  (!%p4943_p6), %s5598_s5, 32, %s439_s27, [#allocation13]  }
  0x74   : > { %s4801_s22 = smov [#allocation15]   ;;  %s4802_s29 = smov [#allocation18]  }
  0x75   : > { %s460_s0 = sshll.u32 %s4801_s22, 4  ;;  %s482_s30 = sshll.u32 %s4802_s29, 4  ;;  %s461_s0 = int_to_ptr.vmem [resolvable:$true] %s460_s0  ;;  %s483_s30 = int_to_ptr.vmem [resolvable:$true] %s482_s30 }
  0x76   : > { %s5599_s7 = sld [smem:[#allocation49_spill]] }
  0x7c   : > { %s4368_s14 = scalar_lea.hbm %s5599_s7, 32 }
  0x7d   : > { %p4369_p1 = scmp.ne.s32.totalorder %s5599_s7, %s4368_s14  ;;  %p4375_p12 = scmp.lt.u32.totalorder %s4368_s14, %s5599_s7 }
  0x7f   : > { %p4371_p3 = pnand %p4369_p1, %p4959_p8 }
  0x81   : > { %p4372_p11 = pneg %p4371_p3 }
  0x83   : > { %p4377_p13 = pnand %p4375_p12, %p4372_p11 }
  0x85   : > { %4380 = shalt.err (!%p4377_p13)
}
  0x86   : > { %s4381_s27 = scalar_lea.vmem %s461_s0, 32  ;;  %p4389_p7 = scmp.lt.s32.totalorder %s461_s0, %s461_s0 }
  0x87   : > { %p4382_p0 = scmp.ne.s32.totalorder %s461_s0, %s4381_s27  ;;  %p4390_p9 = scmp.lt.s32.totalorder %s4381_s27, %s4381_s27 }
  0x89   : > { %p4384_p2 = pnand %p4382_p0, %p4959_p8  ;;  %p4391_p5 = por %p4390_p9, %p4389_p7 }
  0x8b   : > { %p4385_p4 = pneg %p4384_p2 }
  0x8d   : > { %p4392_p10 = pnand %p4391_p5, %p4385_p4 }
  0x8f   : > { %4395 = shalt.err (!%p4392_p10)
}
  0x90   : > { %3738 = dma.hbm_to_vmem [thread:$0]  (!%p4943_p6), %s5599_s7, 32, %s461_s0, [#allocation16]  }
  0x91   : > { %s4396_s19 = scalar_lea.hbm %s5557_s9, 32 }
  0x92   : > { %p4397_p1 = scmp.ne.s32.totalorder %s5557_s9, %s4396_s19  ;;  %p4403_p12 = scmp.lt.u32.totalorder %s4396_s19, %s5557_s9 }
  0x94   : > { %p4399_p3 = pnand %p4397_p1, %p4959_p8 }
  0x96   : > { %p4400_p11 = pneg %p4399_p3 }
  0x98   : > { %p4405_p13 = pnand %p4403_p12, %p4400_p11 }
  0x9a   : > { %4408 = shalt.err (!%p4405_p13)
}
  0x9b   : > { %s4409_s24 = scalar_lea.vmem %s483_s30, 32  ;;  %p4417_p7 = scmp.lt.s32.totalorder %s483_s30, %s483_s30 }
  0x9c   : > { %p4410_p0 = scmp.ne.s32.totalorder %s483_s30, %s4409_s24  ;;  %p4418_p9 = scmp.lt.s32.totalorder %s4409_s24, %s4409_s24 }
  0x9e   : > { %p4412_p2 = pnand %p4410_p0, %p4959_p8  ;;  %p4419_p5 = por %p4418_p9, %p4417_p7 }
  0xa0   : > { %p4413_p4 = pneg %p4412_p2 }
  0xa2   : > { %p4420_p10 = pnand %p4419_p5, %p4413_p4 }
  0xa4   : > { %4423 = shalt.err (!%p4420_p10)
}
  0xa5   : > { %3744 = dma.hbm_to_vmem [thread:$0]  (!%p4943_p6), %s5557_s9, 32, %s483_s30, [#allocation19]  }
  0xa6   : > { %s4803_s27 = smov [#allocation21]   ;;  %s4804_s16 = smov [#allocation11]  }
  0xa7   : > { %s506_s25 = sshll.u32 %s4803_s27, 4  ;;  %s424_s22 = sshll.u32 %s4804_s16, 4  ;;  %s507_s25 = int_to_ptr.vmem [resolvable:$true] %s506_s25  ;;  %s425_s22 = int_to_ptr.vmem [resolvable:$true] %s424_s22 }
  0xa8   : > { %s4424_s20 = scalar_lea.hbm %s5559_s11, 64 }
  0xa9   : > { %p4425_p1 = scmp.ne.s32.totalorder %s5559_s11, %s4424_s20  ;;  %p4431_p12 = scmp.lt.u32.totalorder %s4424_s20, %s5559_s11 }
  0xab   : > { %p4427_p3 = pnand %p4425_p1, %p4959_p8 }
  0xad   : > { %p4428_p11 = pneg %p4427_p3 }
  0xaf   : > { %p4433_p13 = pnand %p4431_p12, %p4428_p11 }
  0xb1   : > { %4436 = shalt.err (!%p4433_p13)
}
  0xb2   : > { %s4437_s30 = scalar_lea.vmem %s507_s25, 64  ;;  %p4445_p7 = scmp.lt.s32.totalorder %s507_s25, %s507_s25 }
  0xb3   : > { %p4438_p0 = scmp.ne.s32.totalorder %s507_s25, %s4437_s30  ;;  %p4446_p9 = scmp.lt.s32.totalorder %s4437_s30, %s4437_s30 }
  0xb5   : > { %p4440_p2 = pnand %p4438_p0, %p4959_p8  ;;  %p4447_p5 = por %p4446_p9, %p4445_p7 }
  0xb7   : > { %p4441_p4 = pneg %p4440_p2 }
  0xb9   : > { %p4448_p10 = pnand %p4447_p5, %p4441_p4 }
  0xbb   : > { %4451 = shalt.err (!%p4448_p10)
}
  0xbc   : > { %3750 = dma.hbm_to_vmem [thread:$0]  (!%p4943_p6), %s5559_s11, 64, %s507_s25, [#allocation22]  }
  0xbd   : > { %s5600_s4 = sld [smem:[#allocation46_spill]] }
  0xc3   : > { %s4452_s29 = scalar_lea.hbm %s5600_s4, 4096 }
  0xc4   : > { %p4453_p1 = scmp.ne.s32.totalorder %s5600_s4, %s4452_s29  ;;  %p4459_p12 = scmp.lt.u32.totalorder %s4452_s29, %s5600_s4 }
  0xc6   : > { %p4455_p3 = pnand %p4453_p1, %p4959_p8 }
  0xc8   : > { %p4456_p11 = pneg %p4455_p3 }
  0xca   : > { %p4461_p13 = pnand %p4459_p12, %p4456_p11 }
  0xcc   : > { %4464 = shalt.err (!%p4461_p13)
}
  0xcd   : > { %s4465_s21 = scalar_lea.vmem %s425_s22, 4096  ;;  %p4473_p7 = scmp.lt.s32.totalorder %s425_s22, %s425_s22 }
  0xce   : > { %p4466_p0 = scmp.ne.s32.totalorder %s425_s22, %s4465_s21  ;;  %p4474_p9 = scmp.lt.s32.totalorder %s4465_s21, %s4465_s21 }
  0xd0   : > { %p4468_p2 = pnand %p4466_p0, %p4959_p8  ;;  %p4475_p5 = por %p4474_p9, %p4473_p7 }
  0xd2   : > { %p4469_p4 = pneg %p4468_p2 }
  0xd4   : > { %p4476_p10 = pnand %p4475_p5, %p4469_p4 }
  0xd6   : > { %4479 = shalt.err (!%p4476_p10)
}
  0xd7   : > { %s4805_s25 = smov 128   ;;  %s4806_s24 = smov 8  }
  0xd8   : > { %3729 = dma.hbm_to_vmem [thread:$0]  (!%p4943_p6), %s5600_s4, 4096, %s425_s22, [#allocation10], %s4805_s25, %s4805_s25, %s4806_s24  }
  0xd9   : > { %s4807_s26 = smov [#allocation14]   ;;  %s4808_s16 = smov [#allocation17]  }
  0xda   : > { %s449_s27 = sshll.u32 %s4807_s26, 4  ;;  %s471_s29 = sshll.u32 %s4808_s16, 4  ;;  %s450_s27 = int_to_ptr.vmem [resolvable:$true] %s449_s27  ;;  %s472_s29 = int_to_ptr.vmem [resolvable:$true] %s471_s29 }
  0xdb   : > { %s5601_s6 = sld [smem:[#allocation48_spill]] }
  0xe1   : > { %s4480_s14 = scalar_lea.hbm %s5601_s6, 32 }
  0xe2   : > { %p4481_p1 = scmp.ne.s32.totalorder %s5601_s6, %s4480_s14  ;;  %p4487_p12 = scmp.lt.u32.totalorder %s4480_s14, %s5601_s6 }
  0xe4   : > { %p4483_p3 = pnand %p4481_p1, %p4959_p8 }
  0xe6   : > { %p4484_p11 = pneg %p4483_p3 }
  0xe8   : > { %p4489_p13 = pnand %p4487_p12, %p4484_p11 }
  0xea   : > { %4492 = shalt.err (!%p4489_p13)
}
  0xeb   : > { %s4493_s22 = scalar_lea.vmem %s450_s27, 32  ;;  %p4501_p7 = scmp.lt.s32.totalorder %s450_s27, %s450_s27 }
  0xec   : > { %p4494_p0 = scmp.ne.s32.totalorder %s450_s27, %s4493_s22  ;;  %p4502_p9 = scmp.lt.s32.totalorder %s4493_s22, %s4493_s22 }
  0xee   : > { %p4496_p2 = pnand %p4494_p0, %p4959_p8  ;;  %p4503_p5 = por %p4502_p9, %p4501_p7 }
  0xf0   : > { %p4497_p4 = pneg %p4496_p2 }
  0xf2   : > { %p4504_p10 = pnand %p4503_p5, %p4497_p4 }
  0xf4   : > { %4507 = shalt.err (!%p4504_p10)
}
  0xf5   : > { %3735 = dma.hbm_to_vmem [thread:$0]  (!%p4943_p6), %s5601_s6, 32, %s450_s27, [#allocation13]  }
  0xf6   : > { %s5602_s8 = sld [smem:[#allocation50_spill]] }
  0xfc   : > { %s4508_s26 = scalar_lea.hbm %s5602_s8, 32 }
  0xfd   : > { %p4509_p1 = scmp.ne.s32.totalorder %s5602_s8, %s4508_s26  ;;  %p4515_p12 = scmp.lt.u32.totalorder %s4508_s26, %s5602_s8 }
  0xff   : > { %p4511_p3 = pnand %p4509_p1, %p4959_p8 }
 0x101   : > { %p4512_p11 = pneg %p4511_p3 }
 0x103   : > { %p4517_p13 = pnand %p4515_p12, %p4512_p11 }
 0x105   : > { %4520 = shalt.err (!%p4517_p13)
}
 0x106   : > { %s4521_s28 = scalar_lea.vmem %s472_s29, 32  ;;  %p4529_p7 = scmp.lt.s32.totalorder %s472_s29, %s472_s29 }
 0x107   : > { %p4522_p0 = scmp.ne.s32.totalorder %s472_s29, %s4521_s28  ;;  %p4530_p9 = scmp.lt.s32.totalorder %s4521_s28, %s4521_s28 }
 0x109   : > { %p4524_p2 = pnand %p4522_p0, %p4959_p8  ;;  %p4531_p5 = por %p4530_p9, %p4529_p7 }
 0x10b   : > { %p4525_p4 = pneg %p4524_p2 }
 0x10d   : > { %p4532_p10 = pnand %p4531_p5, %p4525_p4 }
 0x10f   : > { %4535 = shalt.err (!%p4532_p10)
}
 0x110   : > { %3741 = dma.hbm_to_vmem [thread:$0]  (!%p4943_p6), %s5602_s8, 32, %s472_s29, [#allocation16]  }
 0x111   : > { %s4809_s22 = smov [#allocation20]   ;;  %s4536_s3 = scalar_lea.hbm %s5558_s10, 8192 }
 0x112   : > { %s492_s30 = sshll.u32 %s4809_s22, 4  ;;  %p4537_p1 = scmp.ne.s32.totalorder %s5558_s10, %s4536_s3  ;;  %s493_s30 = int_to_ptr.vmem [resolvable:$true] %s492_s30 }
 0x113   : > { %p4543_p12 = scmp.lt.u32.totalorder %s4536_s3, %s5558_s10 }
 0x114   : > { %p4539_p3 = pnand %p4537_p1, %p4959_p8 }
 0x116   : > { %p4540_p11 = pneg %p4539_p3 }
 0x118   : > { %p4545_p13 = pnand %p4543_p12, %p4540_p11 }
 0x11a   : > { %4548 = shalt.err (!%p4545_p13)
}
 0x11b   : > { %s4549_s29 = scalar_lea.vmem %s493_s30, 8192  ;;  %p4557_p7 = scmp.lt.s32.totalorder %s493_s30, %s493_s30 }
 0x11c   : > { %p4550_p0 = scmp.ne.s32.totalorder %s493_s30, %s4549_s29  ;;  %p4558_p9 = scmp.lt.s32.totalorder %s4549_s29, %s4549_s29 }
 0x11e   : > { %p4552_p2 = pnand %p4550_p0, %p4959_p8  ;;  %p4559_p5 = por %p4558_p9, %p4557_p7 }
 0x120   : > { %p4553_p4 = pneg %p4552_p2 }
 0x122   : > { %p4560_p10 = pnand %p4559_p5, %p4553_p4 }
 0x124   : > { %4563 = shalt.err (!%p4560_p10)
}
 0x125   : > { %s5573_s14 = smov 256   ;;  %s5574_s28 = smov 16  }
 0x126   : > { %3747 = dma.hbm_to_vmem [thread:$0]  (!%p4943_p6), %s5558_s10, 8192, %s493_s30, [#allocation19], %s5573_s14, %s5573_s14, %s5574_s28  }
 0x127   : > { %s4812_s22 = smov [#allocation23]   ;;  %s4813_s2 = smov [#allocation24]  }
 0x128   : > { %s516_s0 = sshll.u32 %s4812_s22, 4  ;;  %s530_s3 = sshll.u32 %s4813_s2, 4  ;;  %s517_s0 = int_to_ptr.vmem [resolvable:$true] %s516_s0  ;;  %s5154_s3 = int_to_ptr.vmem [resolvable:$true] %s530_s3 }
 0x129   : > { %s4564_s19 = scalar_lea.hbm %s5560_s12, 8192 }
 0x12a   : > { %p4565_p1 = scmp.ne.s32.totalorder %s5560_s12, %s4564_s19  ;;  %p4571_p12 = scmp.lt.u32.totalorder %s4564_s19, %s5560_s12 }
 0x12c   : > { %p4567_p3 = pnand %p4565_p1, %p4959_p8 }
 0x12e   : > { %p4568_p11 = pneg %p4567_p3 }
 0x130   : > { %p4573_p13 = pnand %p4571_p12, %p4568_p11 }
 0x132   : > { %4576 = shalt.err (!%p4573_p13)
}
 0x133   : > { %s4577_s21 = scalar_lea.vmem %s517_s0, 8192  ;;  %p4585_p7 = scmp.lt.s32.totalorder %s517_s0, %s517_s0 }
 0x134   : > { %p4578_p0 = scmp.ne.s32.totalorder %s517_s0, %s4577_s21  ;;  %p4586_p9 = scmp.lt.s32.totalorder %s4577_s21, %s4577_s21 }
 0x136   : > { %p4580_p2 = pnand %p4578_p0, %p4959_p8  ;;  %p4587_p5 = por %p4586_p9, %p4585_p7 }
 0x138   : > { %p4581_p4 = pneg %p4580_p2 }
 0x13a   : > { %p4588_p10 = pnand %p4587_p5, %p4581_p4 }
 0x13c   : > { %4591 = shalt.err (!%p4588_p10)
}
 0x13d   : > { %3753 = dma.hbm_to_vmem [thread:$0]  (!%p4943_p6), %s5560_s12, 8192, %s517_s0, [#allocation22], %s4805_s25, %s4805_s25, %s4806_s24  }
 0x13e   : > { %s4592_s19 = scalar_lea.hbm %s5561_s13, 32 }
 0x13f   : > { %p4593_p1 = scmp.ne.s32.totalorder %s5561_s13, %s4592_s19  ;;  %p4599_p12 = scmp.lt.u32.totalorder %s4592_s19, %s5561_s13 }
 0x141   : > { %p4595_p3 = pnand %p4593_p1, %p4959_p8 }
 0x143   : > { %p4596_p11 = pneg %p4595_p3 }
 0x145   : > { %p4601_p13 = pnand %p4599_p12, %p4596_p11 }
 0x147   : > { %4604 = shalt.err (!%p4601_p13)
}
 0x148   : > { %s4605_s25 = scalar_lea.vmem %s5154_s3, 32  ;;  %p4613_p7 = scmp.lt.s32.totalorder %s5154_s3, %s5154_s3 }
 0x149   : > { %p4606_p0 = scmp.ne.s32.totalorder %s5154_s3, %s4605_s25  ;;  %p4614_p9 = scmp.lt.s32.totalorder %s4605_s25, %s4605_s25 }
 0x14b   : > { %p4608_p2 = pnand %p4606_p0, %p4959_p8  ;;  %p4615_p5 = por %p4614_p9, %p4613_p7 }
 0x14d   : > { %p4609_p4 = pneg %p4608_p2 }
 0x14f   : > { %p4616_p10 = pnand %p4615_p5, %p4609_p4 }
 0x151   : > { %4619 = shalt.err (!%p4616_p10)
}
 0x152   : > { %s5603_s21 = sld [smem:[#allocation38_spill]]  ;;  %s5604_s1 = sld [smem:[#allocation37_spill]] }
 0x153   : > { %s5605_s22 = sld [smem:[#allocation40_spill]]  ;;  %s3327_s2 = sadd.s32 4294967294, %s4794_s18  }
 0x154   : > { %3756 = dma.hbm_to_vmem [thread:$0]  (!%p4943_p6), %s5561_s13, 32, %s5154_s3, [#allocation25]  }
 0x155   : > { %s51_s26 = sadd.s32 1, %s4790_s17  ;;  %s58_s23 = sadd.s32 1, %s4782_s15 }
 0x156   : > { %p53_p8 = scmp.ge.s32.totalorder %s51_s26, 2  ;;  %p66_p3 = scmp.eq.s32.totalorder %s4794_s18, 0 }
 0x157   : > { %p381_p7 = scmp.eq.s32.totalorder %s3327_s2, 1  ;;  %p3780_p5 = scmp.lt.s32.totalorder %s4794_s18, 2 }
 0x158   : > { %p65_p1 = scmp.ne.s32.totalorder %s4782_s15, %s5603_s21  ;;  %s5652_s26 = smov (%p53_p8, %s51_s26), 0 }
 0x159   : > { %p71_p12 = scmp.ne.s32.totalorder %s5603_s21, %s5604_s1  ;;  %s55_s3 = ssub.s32 %s4790_s17, %s5652_s26 }
 0x15a   : > { %p5208_p11 = por %p66_p3, %p65_p1  ;;  %p375_p6 = scmp.eq.s32.totalorder %s5605_s22, 1 }
 0x15b   : > { %p56_p13 = scmp.eq.s32.totalorder %s55_s3, 0  ;;  %p5607_p0 = scmp.eq.s32.totalorder %s5605_s22, 0 }
 0x15c   : > { %p5223_p4 = por %p375_p6, %p65_p1  ;;  %p5230_p9 = por %p381_p7, %p71_p12 }
 0x15d   : > { %p5219_p2 = por %p5607_p0, %p71_p12  ;;  %s5236_s30 = sand.u32 1, %s4782_s15  }
 0x15e   : > { %s5609_s20 = scalar_select %p5223_p4, 1, 0 }
 0x15f   : > { %s5608_s19 = scalar_select %p5219_p2, 1, 0 }
 0x160   : > { %s5228_s29 = scalar_select %p56_p13, %s4782_s15, %s58_s23  }
 0x161   : > { %s5610_s27 = scalar_select %p5230_p9, 1, 0 }
 0x162   : > { %s3624_s25 = sshll.u32 %s4790_s17, 9  ;;  %s3342_s24 = sshll.u32 %s5236_s30, 5 }
 0x163   : > { %s5611_s1 = sld [smem:[#allocation42_spill]]  ;;  %s545_s2 = scalar_lea.vmem [#allocation3], %s3342_s24 }
 0x164   : > { %s552_s23 = sshll.u32 %s545_s2, 4  ;;  %p5247_p10 = pnand %p3780_p5, %p5208_p11  ;;  %s5251_s23 = int_to_ptr.vmem [resolvable:$true] %s552_s23 }
 0x165   : > { %s542_s28 = scalar_lea.sflag [#allocation4], %s5236_s30 }
 0x166   : > { %p4622_p1 = pneg %p5247_p10 }
 0x169   : > { %s5243_s22 = scalar_lea.hbm %s5611_s1, %s3624_s25  ;;  %s4625_s24 = scalar_lea.hbm %s5611_s1, 1024 }
 0x16a   : > { %s4620_s0 = scalar_lea.hbm %s5243_s22, 512  ;;  %p4626_p11 = scmp.lt.u32.totalorder %s5243_s22, %s5611_s1 }
 0x16b   : > { %p4621_p8 = scmp.ne.s32.totalorder %s5243_s22, %s4620_s0  ;;  %p4627_p6 = scmp.lt.u32.totalorder %s4625_s24, %s4620_s0 }
 0x16c   : > { %p4629_p0 = scmp.lt.u32.totalorder %s4620_s0, %s5243_s22 }
 0x16d   : > { %p4623_p3 = pnand %p4622_p1, %p4621_p8  ;;  %p4628_p13 = por %p4627_p6, %p4626_p11 }
 0x16f   : > { %p4624_p12 = pneg %p4623_p3  ;;  %p4630_p7 = por %p4629_p0, %p4628_p13 }
 0x171   : > { %p4631_p5 = pnand %p4630_p7, %p4624_p12 }
 0x173   : > { %4634 = shalt.err (!%p4631_p5)
}
 0x174   : > { %s4635_s14 = scalar_lea.vmem %s5251_s23, 512  ;;  %s4814_s25 = smov [#allocation3]  }
 0x175   : > { %p4636_p8 = scmp.ne.s32.totalorder %s5251_s23, %s4635_s14  ;;  %s4640_s16 = sshll.u32 %s4814_s25, 4  ;;  %s4641_s16 = int_to_ptr.vmem [resolvable:$false] %s4640_s16 }
 0x176   : > { %s4642_s21 = scalar_lea.vmem %s4641_s16, 1024  ;;  %p4643_p4 = scmp.lt.s32.totalorder %s5251_s23, %s4641_s16 }
 0x177   : > { %p4638_p3 = pnand %p4636_p8, %p4622_p1  ;;  %p4644_p11 = scmp.lt.s32.totalorder %s4642_s21, %s4635_s14 }
 0x179   : > { %p4639_p9 = pneg %p4638_p3  ;;  %p4645_p6 = por %p4644_p11, %p4643_p4 }
 0x17b   : > { %p4646_p13 = pnand %p4645_p6, %p4639_p9 }
 0x17d   : > { %4649 = shalt.err (!%p4646_p13)
}
 0x17e   : > { %s5613_s0 = smov 16   ;;  %s5614_s24 = smov 256  }
 0x17f   : > { %3760 = dma.hbm_to_vmem [thread:$0]  (!%p5247_p10), %s5243_s22, 512, %s5251_s23, %s542_s28, %s5614_s24, %s5614_s24, %s5613_s0  }
 0x180   : > { %s3345_s2 = sshll.u32 %s4790_s17, 4  ;;  %s5615_s16 = sld [smem:[#allocation43_spill]] }
 0x181   : > { %s565_s4 = scalar_lea.vmem [#allocation6], %s5236_s30  ;;  %s5617_s6 = sand.u32 1, %s4794_s18  }
 0x182   : > { %s572_s5 = sshll.u32 %s565_s4, 4  ;;  %s563_s7 = scalar_lea.sflag [#allocation7], %s5617_s6  ;;  %s573_s5 = int_to_ptr.vmem [resolvable:$true] %s572_s5 }
 0x186   : > { %s5616_s21 = smov %s5615_s16  ;;  %s5289_s1 = scalar_lea.hbm %s5615_s16, %s3345_s2 }
 0x187   : > { %s4650_s8 = scalar_lea.hbm %s5289_s1, 16  ;;  %s4655_s23 = scalar_lea.hbm %s5616_s21, 32 }
 0x188   : > { %p4651_p4 = scmp.ne.s32.totalorder %s5289_s1, %s4650_s8  ;;  %p4656_p0 = scmp.lt.u32.totalorder %s5289_s1, %s5616_s21 }
 0x189   : > { %p4657_p7 = scmp.lt.u32.totalorder %s4655_s23, %s4650_s8  ;;  %p4659_p8 = scmp.lt.u32.totalorder %s4650_s8, %s5289_s1 }
 0x18a   : > { %p4653_p9 = pnand %p4651_p4, %p4622_p1 }
 0x18b   : > { %p4658_p5 = por %p4657_p7, %p4656_p0 }
 0x18c   : > { %p4654_p12 = pneg %p4653_p9 }
 0x18d   : > { %p4660_p3 = por %p4659_p8, %p4658_p5 }
 0x18f   : > { %p4661_p11 = pnand %p4660_p3, %p4654_p12 }
 0x191   : > { %4664 = shalt.err (!%p4661_p11)
}
 0x192   : > { %s4665_s4 = scalar_lea.vmem %s573_s5, 16  ;;  %s4815_s6 = smov [#allocation6]  }
 0x193   : > { %p4666_p6 = scmp.ne.s32.totalorder %s573_s5, %s4665_s4  ;;  %s4670_s30 = sshll.u32 %s4815_s6, 4  ;;  %s4671_s30 = int_to_ptr.vmem [resolvable:$false] %s4670_s30 }
 0x194   : > { %s4672_s2 = scalar_lea.vmem %s4671_s30, 32  ;;  %p4673_p9 = scmp.lt.s32.totalorder %s573_s5, %s4671_s30 }
 0x195   : > { %p4668_p13 = pnand %p4666_p6, %p4622_p1  ;;  %p4674_p2 = scmp.lt.s32.totalorder %s4672_s2, %s4665_s4 }
 0x197   : > { %p4669_p4 = pneg %p4668_p13  ;;  %p4675_p0 = por %p4674_p2, %p4673_p9 }
 0x199   : > { %p4676_p7 = pnand %p4675_p0, %p4669_p4 }
 0x19b   : > { %4679 = shalt.err (!%p4676_p7)
}
 0x19c   : > { %3763 = dma.hbm_to_vmem [thread:$0]  (!%p5247_p10), %s5289_s1, 16, %s573_s5, %s563_s7  }
 0x19d   : > { %s5618_s8 = sld [smem:[#allocation41_spill]] }
 0x1a3   : > { %p5619_p12 = scmp.ne.s32.totalorder %s5618_s8, 0 }
 0x1a4   : > { %s5620_s25 = sld [smem:[#allocation38_spill]] (!%p5619_p12)  ;;  %p5621_p2 = scmp.ne.s32.totalorder (!%p5619_p12), %s5608_s19, 0 }
 0x1a5   : > { %581 = sbr.rel (%p5619_p12) target bundleno = 2911 (0xb5f), region = 76 }
 0x1aa   : > { %s5316_s14 = sand.u32 (!%p5619_p12), 1, %s5620_s25  }
 0x1ab   : > { %s3347_s16 = sshll.u32 (!%p5619_p12), %s5316_s14, 5  ;;  %s584_s28 = scalar_lea.sflag (!%p5619_p12), [#allocation4], %s5316_s14 }
 0x1ac   : > { %s5322_s22 = scalar_lea.vmem [#allocation3], %s3347_s16 }
 0x1ad   : > { %4733 = dma.done.wait (%p5621_p2), %s584_s28, 512  }
 0x1ae   : > { %4735 = vsyncadd (%p5621_p2), %s584_s28, 4294966784  ;;  %s5622_s5 = sld [smem:[#allocation40_spill]]  ;;  %s595_s3 = scalar_lea.vmem [#allocation6], %s5316_s14 }
 0x1b4   : > { %s592_s7 = sand.u32 1, %s5622_s5  }
 0x1b5   : > { %s593_s1 = scalar_lea.sflag [#allocation7], %s592_s7 }
 0x1b6   : > { %4737 = dma.done.wait (%p5621_p2), %s593_s1, 16  }
 0x1b7   : > { %4739 = vsyncadd (%p5621_p2), %s593_s1, 4294967280  ;;  %p5623_p10 = scmp.eq.s32.totalorder %s5622_s5, 0 }
 0x1b9   : > { %4741 = dma.done.wait (%p5623_p10), [#allocation7], 12288   ;;  %p5624_p1 = pmov %p5623_p10 }
 0x1bb   : > { %4743 = vsyncadd (%p5624_p1), [#allocation7], 4294955008  ;;  %p5625_p5 = pmov %p5624_p1 }
 0x1bc   : > { %p5626_p8 = pmov %p5624_p1 }
 0x1bd   : > { %4745 = dma.done.wait (%p5625_p5), [#allocation10], 4192  }
 0x1be   : > { %4747 = vsyncadd (%p5626_p8), [#allocation10], 4294963104  ;;  %p5627_p3 = pmov %p5624_p1 }
 0x1bf   : > { %p5628_p11 = pmov %p5624_p1 }
 0x1c0   : > { %4749 = dma.done.wait (%p5627_p3), [#allocation13], 64  }
 0x1c1   : > { %4751 = vsyncadd (%p5628_p11), [#allocation13], 4294967232  ;;  %p5629_p6 = pmov %p5624_p1 }
 0x1c2   : > { %p5630_p13 = pmov %p5624_p1 }
 0x1c3   : > { %4753 = dma.done.wait (%p5629_p6), [#allocation16], 64  }
 0x1c4   : > { %4755 = vsyncadd (%p5630_p13), [#allocation16], 4294967232  ;;  %p5631_p4 = pmov %p5624_p1 }
 0x1c5   : > { %p5632_p9 = pmov %p5624_p1 }
 0x1c6   : > { %4757 = dma.done.wait (%p5631_p4), [#allocation19], 8224  }
 0x1c7   : > { %4759 = vsyncadd (%p5632_p9), [#allocation19], 4294959072  ;;  %p5633_p0 = pmov %p5624_p1 }
 0x1c9   : > { %4761 = dma.done.wait (%p5633_p0), [#allocation22], 8256   ;;  %p5634_p7 = pmov %p5633_p0 }
 0x1ca   : > { %p5635_p12 = pmov %p5633_p0 }
 0x1cb   : > { %4763 = vsyncadd (%p5634_p7), [#allocation22], 4294959040 }
 0x1cc   : > { %4765 = dma.done.wait (%p5635_p12), [#allocation25], 32   ;;  %p5636_p2 = pmov %p5633_p0 }
 0x1cd   : > { %v694_v0 = vld [vmem:[%s5322_s22] sm:$0xff]  ;;  %v695_v1 = vld [vmem:[%s5322_s22 + $0x8] sm:$0xff]  ;;  %v696_v2 = vld [vmem:[%s5322_s22 + $0x10] sm:$0xff]  ;;  %vm4817_vm4 = vmmov 0   ;;  %vm1576_vm6 = vcmask 130048   ;;  %s5637_s19 = sld [smem:[#allocation39_spill]] }
 0x1ce   : > { %4767 = vsyncadd (%p5636_p2), [#allocation25], 4294967264  ;;  %v701_v3 = vadd.f32 %v695_v1, %v694_v0  ;;  %v697_v4 = vld [vmem:[%s5322_s22 + $0x18] sm:$0xff]  ;;  %v3869_v9 = vld [vmem:[#allocation8 + $0x10] ss:$24 sps:$4 sm:$0xff]   ;;  %s691_s23 = scalar_lea.vmem [#allocation26], %s3347_s16 }
 0x1cf   : > { %v704_v5 = vadd.f32 %v697_v4, %v696_v2  ;;  %v3864_v6 = vld [vmem:[#allocation8 + $0x4] ss:$24 sps:$4 sm:$0xff]   ;;  %v3866_v7 = vld [vmem:[#allocation8] ss:$24 sps:$4 sm:$0xff]   ;;  %v3867_v8 = vld [vmem:[#allocation8 + $0x14] ss:$24 sps:$4 sm:$0xff]  }
 0x1d0   : > { %702 = vadd.xlane.f32.xlu0 %v701_v3  ;;  %v3870_v10 = vld [vmem:[#allocation8 + $0x34] ss:$24 sps:$4 sm:$0xff]   ;;  %1388 = vmatprep.subr.bf16.mxu1 %v3864_v6  ;;  %v3873_v11 = vld [vmem:[#allocation8 + $0x44] ss:$24 sps:$4 sm:$0xff]   ;;  %v3872_v12 = vld [vmem:[#allocation8 + $0x30] ss:$24 sps:$4 sm:$0xff]  }
 0x1d1   : > { %1474 = vmatprep.subr.bf16.mxu0 %v3867_v8  ;;  %1389 = vmatpush1.bf16.msra.mxu1 %v3866_v7  ;;  %v3875_v13 = vld [vmem:[#allocation8 + $0x40] ss:$24 sps:$4 sm:$0xff]   ;;  %v3876_v14 = vld [vmem:[#allocation8 + $0x64] ss:$24 sps:$4 sm:$0xff]   ;;  %v3879_v15 = vld [vmem:[#allocation8 + $0x74] ss:$24 sps:$4 sm:$0xff]  }
 0x1d2   : > { %1475 = vmatpush1.bf16.msra.mxu0 %v3869_v9  ;;  %1390 = vmatprep.subr.bf16.mxu1 %v3870_v10  ;;  %v3878_v16 = vld [vmem:[#allocation8 + $0x60] ss:$24 sps:$4 sm:$0xff]   ;;  %v3881_v17 = vld [vmem:[#allocation8 + $0x70] ss:$24 sps:$4 sm:$0xff]   ;;  %v3882_v18 = vld [vmem:[#allocation8 + $0x94] ss:$24 sps:$4 sm:$0xff]  }
 0x1d3   : > { %1476 = vmatprep.subr.bf16.mxu0 %v3873_v11  ;;  %v3885_v19 = vld [vmem:[#allocation8 + $0xa4] ss:$24 sps:$4 sm:$0xff]   ;;  %v3884_v20 = vld [vmem:[#allocation8 + $0x90] ss:$24 sps:$4 sm:$0xff]   ;;  %v3887_v21 = vld [vmem:[#allocation8 + $0xa0] ss:$24 sps:$4 sm:$0xff]  }
 0x1d4   : > { %705 = vadd.xlane.f32.xlu0 %v704_v5  ;;  %v3888_v22 = vld [vmem:[#allocation8 + $0xc4] ss:$24 sps:$4 sm:$0xff]   ;;  %v3891_v23 = vld [vmem:[#allocation8 + $0xd4] ss:$24 sps:$4 sm:$0xff]   ;;  %v3890_v24 = vld [vmem:[#allocation8 + $0xc0] ss:$24 sps:$4 sm:$0xff]  }
 0x1d5   : > { %1391 = vmatpush1.bf16.msra.mxu1 %v3872_v12  ;;  %v3893_v25 = vld [vmem:[#allocation8 + $0xd0] ss:$24 sps:$4 sm:$0xff]   ;;  %v3894_v26 = vld [vmem:[#allocation8 + $0xf4] ss:$24 sps:$4 sm:$0xff]   ;;  %v3897_v27 = vld [vmem:[#allocation8 + $0x104] ss:$24 sps:$4 sm:$0xff]  }
 0x1d6   : > { %1477 = vmatpush1.bf16.msra.mxu0 %v3875_v13  ;;  %1392 = vmatprep.subr.bf16.mxu1 %v3876_v14  ;;  %v3896_v28 = vld [vmem:[#allocation8 + $0xf0] ss:$24 sps:$4 sm:$0xff]   ;;  %v3899_v29 = vld [vmem:[#allocation8 + $0x100] ss:$24 sps:$4 sm:$0xff]   ;;  %v3900_v44 = vld [vmem:[#allocation8 + $0x124] ss:$24 sps:$4 sm:$0xff]  }
 0x1d7   : > { %1478 = vmatprep.subr.bf16.mxu0 %v3879_v15  ;;  %v3902_v45 = vld [vmem:[#allocation8 + $0x120] ss:$24 sps:$4 sm:$0xff]   ;;  %v3903_v46 = vld [vmem:[#allocation8 + $0x134] ss:$24 sps:$4 sm:$0xff]   ;;  %v3905_v47 = vld [vmem:[#allocation8 + $0x130] ss:$24 sps:$4 sm:$0xff]  }
 0x1d8   : > { %v3906_v48 = vld [vmem:[#allocation8 + $0x154] ss:$24 sps:$4 sm:$0xff]   ;;  %v3908_v49 = vld [vmem:[#allocation8 + $0x150] ss:$24 sps:$4 sm:$0xff]   ;;  %v3909_v50 = vld [vmem:[#allocation8 + $0x164] ss:$24 sps:$4 sm:$0xff]  }
 0x1d9   : > { %1393 = vmatpush1.bf16.msra.mxu1 %v3878_v16  ;;  %v3911_v51 = vld [vmem:[#allocation8 + $0x160] ss:$24 sps:$4 sm:$0xff]   ;;  %v3912_v52 = vld [vmem:[#allocation8 + $0x184] ss:$24 sps:$4 sm:$0xff]   ;;  %v3915_v54 = vld [vmem:[#allocation8 + $0x194] ss:$24 sps:$4 sm:$0xff]  }
 0x1da   : > { %1479 = vmatpush1.bf16.msra.mxu0 %v3881_v17  ;;  %1394 = vmatprep.subr.bf16.mxu1 %v3882_v18  ;;  %v3914_v53 = vld [vmem:[#allocation8 + $0x180] ss:$24 sps:$4 sm:$0xff]   ;;  %v3917_v55 = vld [vmem:[#allocation8 + $0x190] ss:$24 sps:$4 sm:$0xff]   ;;  %v3918_v56 = vld [vmem:[#allocation8 + $0x1b4] ss:$24 sps:$4 sm:$0xff]  }
 0x1db   : > { %1480 = vmatprep.subr.bf16.mxu0 %v3885_v19  ;;  %v3920_v57 = vld [vmem:[#allocation8 + $0x1b0] ss:$24 sps:$4 sm:$0xff]   ;;  %v3921_v58 = vld [vmem:[#allocation8 + $0x1c4] ss:$24 sps:$4 sm:$0xff]   ;;  %v3923_v59 = vld [vmem:[#allocation8 + $0x1c0] ss:$24 sps:$4 sm:$0xff]  }
 0x1dc   : > { %v3924_v60 = vld [vmem:[#allocation8 + $0x1e4] ss:$24 sps:$4 sm:$0xff]   ;;  %v3926_v61 = vld [vmem:[#allocation8 + $0x1e0] ss:$24 sps:$4 sm:$0xff]   ;;  %v3927_v62 = vld [vmem:[#allocation8 + $0x1f4] ss:$24 sps:$4 sm:$0xff]  }
 0x1dd   : > { %1395 = vmatpush1.bf16.msra.mxu1 %v3884_v20  ;;  %v3929_v63 = vld [vmem:[#allocation8 + $0x1f0] ss:$24 sps:$4 sm:$0xff]   ;;  %v3935_v3 = vld [vmem:[#allocation8 + $0x220] ss:$24 sps:$4 sm:$0xff]   ;;  %v3939_v5 = vld [vmem:[#allocation8 + $0x254] ss:$24 sps:$4 sm:$0xff]  }
 0x1de   : > { %1481 = vmatpush1.bf16.msra.mxu0 %v3887_v21  ;;  %1396 = vmatprep.subr.bf16.mxu1 %v3888_v22  ;;  %v3938_v6 = vld [vmem:[#allocation8 + $0x240] ss:$24 sps:$4 sm:$0xff]   ;;  %v3941_v7 = vld [vmem:[#allocation8 + $0x250] ss:$24 sps:$4 sm:$0xff]   ;;  %v3942_v8 = vld [vmem:[#allocation8 + $0x274] ss:$24 sps:$4 sm:$0xff]  }
 0x1df   : > { %1482 = vmatprep.subr.bf16.mxu0 %v3891_v23  ;;  %v3945_v9 = vld [vmem:[#allocation8 + $0x284] ss:$24 sps:$4 sm:$0xff]   ;;  %v3944_v10 = vld [vmem:[#allocation8 + $0x270] ss:$24 sps:$4 sm:$0xff]   ;;  %v3947_v11 = vld [vmem:[#allocation8 + $0x280] ss:$24 sps:$4 sm:$0xff]  }
 0x1e0   : > { %v3948_v12 = vld [vmem:[#allocation8 + $0x2a4] ss:$24 sps:$4 sm:$0xff]   ;;  %v3951_v13 = vld [vmem:[#allocation8 + $0x2b4] ss:$24 sps:$4 sm:$0xff]   ;;  %v3950_v14 = vld [vmem:[#allocation8 + $0x2a0] ss:$24 sps:$4 sm:$0xff]  }
 0x1e1   : > { %1397 = vmatpush1.bf16.msra.mxu1 %v3890_v24  ;;  %v3953_v15 = vld [vmem:[#allocation8 + $0x2b0] ss:$24 sps:$4 sm:$0xff]   ;;  %v3954_v16 = vld [vmem:[#allocation8 + $0x2d4] ss:$24 sps:$4 sm:$0xff]   ;;  %v3957_v17 = vld [vmem:[#allocation8 + $0x2e4] ss:$24 sps:$4 sm:$0xff]  }
 0x1e2   : > { %1483 = vmatpush1.bf16.msra.mxu0 %v3893_v25  ;;  %1398 = vmatprep.subr.bf16.mxu1 %v3894_v26  ;;  %v3956_v18 = vld [vmem:[#allocation8 + $0x2d0] ss:$24 sps:$4 sm:$0xff]   ;;  %v3959_v19 = vld [vmem:[#allocation8 + $0x2e0] ss:$24 sps:$4 sm:$0xff]   ;;  %v3962_v20 = vld [vmem:[#allocation8 + $0xc] ss:$24 sps:$4 sm:$0xff]  }
 0x1e3   : > { %1484 = vmatprep.subr.bf16.mxu0 %v3897_v27  ;;  %v745_v27 = vlaneseq  ;;  %s3108_s0 = sshll.u32 %s691_s23, 4  ;;  %s3625_s24 = sshll.u32 %s5637_s19, 9  ;;  %s5491_s0 = int_to_ptr.vmem [resolvable:$true] %s3108_s0 }
 0x1e4   : > { %s5638_s30 = sld [smem:[#allocation51_spill]]  ;;  %s3092_s25 = scalar_lea.sflag [#allocation5], %s5316_s14 }
 0x1e5   : > { %1399 = vmatpush1.bf16.msra.mxu1 %v3896_v28  ;;  %s4680_s16 = scalar_lea.vmem %s5491_s0, 512  ;;  %p5640_p1 = scmp.ne.s32.totalorder %s5609_s20, 0 }
 0x1e6   : > { %1485 = vmatpush1.bf16.msra.mxu0 %v3899_v29  ;;  %1400 = vmatprep.subr.bf16.mxu1 %v3900_v44  ;;  %p4681_p10 = scmp.ne.s32.totalorder %s5491_s0, %s4680_s16  ;;  %s4818_s28 = smov [#allocation26]  }
 0x1e7   : > { %1486 = vmatprep.subr.bf16.mxu0 %v3903_v46 }
 0x1e8   : > { %p4682_p5 = pnand %p4681_p10, %p5640_p1 }
 0x1e9   : > { %1401 = vmatpush1.bf16.msra.mxu1 %v3902_v45  ;;  %v699_v45 = vld [vmem:[#allocation14] sm:$0x3] }
 0x1ea   : > { %1487 = vmatpush1.bf16.msra.mxu0 %v3905_v47  ;;  %1402 = vmatprep.subr.bf16.mxu1 %v3906_v48  ;;  %s5639_s2 = smov %s5638_s30  ;;  %s5498_s8 = scalar_lea.hbm %s5638_s30, %s3625_s24 }
 0x1eb   : > { %1488 = vmatprep.subr.bf16.mxu0 %v3909_v50  ;;  %p4683_p8 = pneg %p4682_p5 }
 0x1ed   : > { %1403 = vmatpush1.bf16.msra.mxu1 %v3908_v49  ;;  %v700_v49 = vld [vmem:[#allocation15] sm:$0x3] }
 0x1ee   : > { %1489 = vmatpush1.bf16.msra.mxu0 %v3911_v51  ;;  %1404 = vmatprep.subr.bf16.mxu1 %v3912_v52 }
 0x1ef   : > { %1490 = vmatprep.subr.bf16.mxu0 %v3915_v54 }
 0x1f1   : > { %1405 = vmatpush1.bf16.msra.mxu1 %v3914_v53 }
 0x1f2   : > { %1491 = vmatpush1.bf16.msra.mxu0 %v3917_v55  ;;  %1406 = vmatprep.subr.bf16.mxu1 %v3918_v56 }
 0x1f3   : > { %1492 = vmatprep.subr.bf16.mxu0 %v3921_v58 }
 0x1f5   : > { %1407 = vmatpush1.bf16.msra.mxu1 %v3920_v57 }
 0x1f6   : > { %1493 = vmatpush1.bf16.msra.mxu0 %v3923_v59  ;;  %1408 = vmatprep.subr.bf16.mxu1 %v3924_v60 }
 0x1f7   : > { %1494 = vmatprep.subr.bf16.mxu0 %v3927_v62 }
 0x1f9   : > { %1409 = vmatpush1.bf16.msra.mxu1 %v3926_v61 }
 0x1fa   : > { %1495 = vmatpush1.bf16.msra.mxu0 %v3929_v63 }
 0x25d   : > { %v703_v30 = vpop.xlane.xlu0 %702 }
 0x25e   : > { %v708_v31 = vmul.f32 0.00390625, %v703_v30 }
 0x260   : > { %v5366_v32 = vsub.f32 %v694_v0, %v708_v31  ;;  %v5368_v33 = vsub.f32 %v695_v1, %v708_v31  ;;  %v3930_v0 = vld [vmem:[#allocation8 + $0x214] ss:$24 sps:$4 sm:$0xff]   ;;  %v3932_v1 = vld [vmem:[#allocation8 + $0x210] ss:$24 sps:$4 sm:$0xff]  }
 0x261   : > { %v706_v34 = vpop.xlane.xlu0 %705  ;;  %1410 = vmatprep.subr.bf16.mxu1 %v3930_v0 }
 0x262   : > { %v709_v35 = vmul.f32 0.00390625, %v706_v34  ;;  %v714_v36 = vmul.f32 %v5366_v32, %v5366_v32  ;;  %v715_v37 = vmul.f32 %v5368_v33, %v5368_v33  ;;  %1411 = vmatpush1.bf16.msra.mxu1 %v3932_v1  ;;  %v3960_v1 = vld [vmem:[#allocation8 + $0x8] ss:$24 sps:$4 sm:$0xff]  }
 0x264   : > { %v5374_v38 = vsub.f32 %v696_v2, %v709_v35  ;;  %v5376_v39 = vsub.f32 %v697_v4, %v709_v35  ;;  %v718_v40 = vadd.f32 %v715_v37, %v714_v36  ;;  %v3933_v2 = vld [vmem:[#allocation8 + $0x224] ss:$24 sps:$4 sm:$0xff]   ;;  %v5382_v36 = vshrl.u32 %v745_v27, 7  ;;  %v4002_v27 = vld [vmem:[#allocation8 + $0x2a8] ss:$24 sps:$4 sm:$0xff]  }
 0x265   : > { %v3936_v4 = vld [vmem:[#allocation8 + $0x244] ss:$24 sps:$4 sm:$0xff]   ;;  %1496 = vmatprep.subr.bf16.mxu0 %v3933_v2 }
 0x266   : > { %v716_v41 = vmul.f32 %v5374_v38, %v5374_v38  ;;  %v717_v42 = vmul.f32 %v5376_v39, %v5376_v39  ;;  %719 = vadd.xlane.f32.xlu1 %v718_v40  ;;  %1497 = vmatpush1.bf16.msra.mxu0 %v3935_v3  ;;  %v5388_v44 = vsub.s32 1, %v5382_v36  ;;  %v3968_v2 = vld [vmem:[#allocation8 + $0x6c] ss:$24 sps:$4 sm:$0xff]   ;;  %v3966_v3 = vld [vmem:[#allocation8 + $0x68] ss:$24 sps:$4 sm:$0xff]  }
 0x267   : > { %1412 = vmatprep.subr.bf16.mxu1 %v3936_v4  ;;  %1498 = vmatprep.subr.bf16.mxu0 %v3939_v5  ;;  %v3971_v4 = vld [vmem:[#allocation8 + $0x9c] ss:$24 sps:$4 sm:$0xff]   ;;  %v3969_v5 = vld [vmem:[#allocation8 + $0x98] ss:$24 sps:$4 sm:$0xff]  }
 0x268   : > { %v721_v43 = vadd.f32 %v717_v42, %v716_v41  ;;  %1413 = vmatpush1.bf16.msra.mxu1 %v3938_v6  ;;  %v752_v47 = vrot.slane %v699_v45, %v5388_v44  ;;  %v771_v55 = vrot.slane %v700_v49, %v5388_v44  ;;  %v3974_v6 = vld [vmem:[#allocation8 + $0xcc] ss:$24 sps:$4 sm:$0xff]  }
 0x269   : > { %1414 = vmatprep.subr.bf16.mxu1 %v3942_v8  ;;  %v3977_v8 = vld [vmem:[#allocation8 + $0xfc] ss:$24 sps:$4 sm:$0xff]  }
 0x26a   : > { %722 = vadd.xlane.f32.xlu1 %v721_v43  ;;  %1499 = vmatpush1.bf16.msra.mxu0 %v3941_v7  ;;  %v5385_v43 = vsub.s32 0, %v5382_v36  ;;  %v756_v51 = vmul.f32 %v752_v47, %v5368_v33  ;;  %v758_v53 = vmul.f32 %v752_v47, %v5376_v39  ;;  %v3963_v39 = vld [vmem:[#allocation8 + $0x38] ss:$24 sps:$4 sm:$0xff]   ;;  %v3972_v7 = vld [vmem:[#allocation8 + $0xc8] ss:$24 sps:$4 sm:$0xff]  }
 0x26b   : > { %1500 = vmatprep.subr.bf16.mxu0 %v3945_v9  ;;  %v3975_v9 = vld [vmem:[#allocation8 + $0xf8] ss:$24 sps:$4 sm:$0xff]  }
 0x26c   : > { %1415 = vmatpush1.bf16.msra.mxu1 %v3944_v10  ;;  %v748_v46 = vrot.slane %v699_v45, %v5385_v43  ;;  %v767_v57 = vrot.slane %v700_v49, %v5385_v43  ;;  %v3980_v10 = vld [vmem:[#allocation8 + $0x12c] ss:$24 sps:$4 sm:$0xff]  }
 0x26d   : > { %1416 = vmatprep.subr.bf16.mxu1 %v3948_v12  ;;  %v3983_v12 = vld [vmem:[#allocation8 + $0x15c] ss:$24 sps:$4 sm:$0xff]  }
 0x26e   : > { %1501 = vmatpush1.bf16.msra.mxu0 %v3947_v11  ;;  %v755_v50 = vmul.f32 %v748_v46, %v5366_v32  ;;  %v757_v52 = vmul.f32 %v748_v46, %v5374_v38  ;;  %v3965_v38 = vld [vmem:[#allocation8 + $0x3c] ss:$24 sps:$4 sm:$0xff]   ;;  %v3978_v11 = vld [vmem:[#allocation8 + $0x128] ss:$24 sps:$4 sm:$0xff]  }
 0x26f   : > { %1502 = vmatprep.subr.bf16.mxu0 %v3951_v13  ;;  %v3981_v13 = vld [vmem:[#allocation8 + $0x158] ss:$24 sps:$4 sm:$0xff]  }
 0x270   : > { %1417 = vmatpush1.bf16.msra.mxu1 %v3950_v14  ;;  %v3986_v14 = vld [vmem:[#allocation8 + $0x18c] ss:$24 sps:$4 sm:$0xff]  }
 0x271   : > { %1418 = vmatprep.subr.bf16.mxu1 %v3954_v16  ;;  %v3989_v16 = vld [vmem:[#allocation8 + $0x1bc] ss:$24 sps:$4 sm:$0xff]  }
 0x272   : > { %1503 = vmatpush1.bf16.msra.mxu0 %v3953_v15  ;;  %v3984_v15 = vld [vmem:[#allocation8 + $0x188] ss:$24 sps:$4 sm:$0xff]  }
 0x273   : > { %1504 = vmatprep.subr.bf16.mxu0 %v3957_v17  ;;  %v3987_v17 = vld [vmem:[#allocation8 + $0x1b8] ss:$24 sps:$4 sm:$0xff]  }
 0x274   : > { %1419 = vmatpush1.bf16.msra.mxu1 %v3956_v18  ;;  %v3992_v18 = vld [vmem:[#allocation8 + $0x1ec] ss:$24 sps:$4 sm:$0xff]  }
 0x275   : > { %1431 = vmatprep.subr.bf16.mxu1 %v3962_v20  ;;  %v3995_v20 = vld [vmem:[#allocation8 + $0x21c] ss:$24 sps:$4 sm:$0xff]  }
 0x276   : > { %1505 = vmatpush1.bf16.msra.mxu0 %v3959_v19  ;;  %v3990_v19 = vld [vmem:[#allocation8 + $0x1e8] ss:$24 sps:$4 sm:$0xff]  }
 0x2f3   : > { %v720_v21 = vpop.xlane.xlu1 %719 }
 0x2f4   : > { %v724_v22 = vmul.f32 0.003921569, %v720_v21  ;;  %v3993_v21 = vld [vmem:[#allocation8 + $0x218] ss:$24 sps:$4 sm:$0xff]  }
 0x2f6   : > { %4248 = vrsqrt.f32 %v724_v22  ;;  %vm728_vm0 = vcmp.eq.f32.partialorder %v724_v22, inf  ;;  %v731_v28 = vand.u32 2147483648, %v724_v22  ;;  %vm730_vm1 = vcmp.eq.f32.partialorder %v724_v22, 0.0 }
 0x2f7   : > { %v723_v23 = vpop.xlane.xlu1 %722 }
 0x2f8   : > { %v725_v24 = vmul.f32 0.003921569, %v723_v23  ;;  %v3996_v23 = vld [vmem:[#allocation8 + $0x248] ss:$24 sps:$4 sm:$0xff]  }
 0x2fa   : > { %4250 = vrsqrt.f32 %v725_v24  ;;  %vm735_vm2 = vcmp.eq.f32.partialorder %v725_v24, inf  ;;  %v738_v37 = vand.u32 2147483648, %v725_v24  ;;  %vm737_vm3 = vcmp.eq.f32.partialorder %v725_v24, 0.0 }
 0x300   : > { %v4249_v25 = vpop.eup %4248 }
 0x301   : > { %v727_v26 = vmul.f32 %v4249_v25, %v724_v22  ;;  %v3999_v25 = vld [vmem:[#allocation8 + $0x278] ss:$24 sps:$4 sm:$0xff]  }
 0x303   : > { %v729_v29 = vsel %vm728_vm0, %v724_v22, %v727_v26  ;;  %v3998_v22 = vld [vmem:[#allocation8 + $0x24c] ss:$24 sps:$4 sm:$0xff]  }
 0x304   : > { %v4251_v30 = vpop.eup %4250  ;;  %v732_v31 = vsel %vm730_vm1, %v731_v28, %v729_v29  ;;  %v4004_v26 = vld [vmem:[#allocation8 + $0x2ac] ss:$24 sps:$4 sm:$0xff]   ;;  %v4007_v28 = vld [vmem:[#allocation8 + $0x2dc] ss:$24 sps:$4 sm:$0xff]   ;;  %v4005_v29 = vld [vmem:[#allocation8 + $0x2d8] ss:$24 sps:$4 sm:$0xff]  }
 0x305   : > { %v734_v34 = vmul.f32 %v4251_v30, %v725_v24  ;;  %v740_v35 = vadd.f32 1e-06, %v732_v31  ;;  %v4816_v30 = vmov 0.0   ;;  %v896_v31 = vsub.s32 4, %v5382_v36 }
 0x306   : > { %3634 = vmatprep.subr.bf16.mxu0 %v4816_v30 }
 0x307   : > { %v736_v40 = vsel %vm735_vm2, %v725_v24, %v734_v34  ;;  %4252 = vrcp.f32 %v740_v35  ;;  %v4001_v24 = vld [vmem:[#allocation8 + $0x27c] ss:$24 sps:$4 sm:$0xff]   ;;  %v876_v34 = vld [vmem:[#allocation9] sm:$0x3f]  ;;  %v900_v35 = vsub.s32 5, %v5382_v36 }
 0x308   : > { %v739_v41 = vsel %vm737_vm3, %v738_v37, %v736_v40  ;;  %v881_v37 = vrot.slane %v876_v34, %v5385_v43  ;;  %v897_v40 = vrot.slane %v876_v34, %v896_v31  ;;  %v885_v45 = vrot.slane %v876_v34, %v5388_v44 }
 0x309   : > { %v741_v42 = vadd.f32 1e-06, %v739_v41  ;;  %v901_v46 = vrot.slane %v876_v34, %v900_v35 }
 0x30b   : > { %4254 = vrcp.f32 %v741_v42 }
 0x311   : > { %v4253_v48 = vpop.eup %4252 }
 0x312   : > { %v760_v54 = vmul.f32 %v4253_v48, %v756_v51  ;;  %v759_v56 = vmul.f32 %v4253_v48, %v755_v50 }
 0x314   : > { %v775_v61 = vadd.f32 %v771_v55, %v760_v54  ;;  %v774_v63 = vadd.f32 %v767_v57, %v759_v56 }
 0x315   : > { %v4255_v58 = vpop.eup %4254 }
 0x316   : > { %v762_v59 = vmul.f32 %v4255_v58, %v758_v53  ;;  %v761_v60 = vmul.f32 %v4255_v58, %v757_v52 }
 0x318   : > { %v777_v62 = vadd.f32 %v771_v55, %v762_v59  ;;  %v776_v0 = vadd.f32 %v767_v57, %v761_v60 }
 0x31a   : > { %v779_v32 = vpack.c.bf16 %v777_v62, %v775_v61  ;;  %v5398_v33 = vpack.c.bf16 %v776_v0, %v774_v63 }
 0x31c   : > { %1420 = vmatprep.mubr.bf16.mxu1 %v779_v32  ;;  %1506 = vmatprep.mubr.bf16.mxu0 %v779_v32 }
 0x31d   : > { %1421 = vmatmul.mubr.bf16.vlgmr.msra.gmra.mrb[0].mxu1 %v5398_v33  ;;  %1507 = vmatmul.mubr.bf16.vlgmr.msra.gmra.mrb[0].mxu0 %v5398_v33 }
 0x31e   : > { %1432 = vmatpush1.bf16.msra.mxu1 %v3960_v1  ;;  %1463 = vmatprep.mubr.bf16.mxu1 %v779_v32  ;;  %v888_v32 = vsub.s32 2, %v5382_v36  ;;  %v892_v1 = vsub.s32 3, %v5382_v36 }
 0x31f   : > { %1433 = vmatprep.subr.bf16.mxu1 %v3965_v38  ;;  %3636 = vmatprep.mubr.msk.bf16.mxu0 %vm4817_vm4, %v4816_v30 }
 0x322   : > { %1434 = vmatpush1.bf16.msra.mxu1 %v3963_v39  ;;  %v893_v39 = vrot.slane %v876_v34, %v892_v1 }
 0x323   : > { %1435 = vmatprep.subr.bf16.mxu1 %v3968_v2 }
 0x326   : > { %1436 = vmatpush1.bf16.msra.mxu1 %v3966_v3 }
 0x327   : > { %1437 = vmatprep.subr.bf16.mxu1 %v3971_v4 }
 0x32a   : > { %1438 = vmatpush1.bf16.msra.mxu1 %v3969_v5 }
 0x32b   : > { %1439 = vmatprep.subr.bf16.mxu1 %v3974_v6 }
 0x32e   : > { %1440 = vmatpush1.bf16.msra.mxu1 %v3972_v7 }
 0x32f   : > { %1441 = vmatprep.subr.bf16.mxu1 %v3977_v8 }
 0x332   : > { %1442 = vmatpush1.bf16.msra.mxu1 %v3975_v9 }
 0x333   : > { %1443 = vmatprep.subr.bf16.mxu1 %v3980_v10 }
 0x336   : > { %1444 = vmatpush1.bf16.msra.mxu1 %v3978_v11  ;;  %v698_v11 = vld [vmem:[%s595_s3] sm:$0x1] }
 0x337   : > { %1445 = vmatprep.subr.bf16.mxu1 %v3983_v12  ;;  %vm1523_vm5 = vcmp.eq.f32.partialorder %v698_v11, 0.0  ;;  %v4011_v11 = vld [vmem:[#allocation11 + $0x10] ss:$8 sps:$4 sm:$0xff]  }
 0x338   : > { %v1524_v12 = vsel %vm1523_vm5, -1e+09, %v4816_v30 }
 0x33a   : > { %1446 = vmatpush1.bf16.msra.mxu1 %v3981_v13 }
 0x33b   : > { %1447 = vmatprep.subr.bf16.mxu1 %v3986_v14  ;;  %v1572_v14 = vrot.slane %v1524_v12, %v5385_v43 }
 0x33e   : > { %1448 = vmatpush1.bf16.msra.mxu1 %v3984_v15 }
 0x33f   : > { %1449 = vmatprep.subr.bf16.mxu1 %v3989_v16 }
 0x342   : > { %1450 = vmatpush1.bf16.msra.mxu1 %v3987_v17 }
 0x343   : > { %1451 = vmatprep.subr.bf16.mxu1 %v3992_v18 }
 0x346   : > { %1452 = vmatpush1.bf16.msra.mxu1 %v3990_v19 }
 0x347   : > { %1453 = vmatprep.subr.bf16.mxu1 %v3995_v20 }
 0x34a   : > { %1454 = vmatpush1.bf16.msra.mxu1 %v3993_v21 }
 0x34b   : > { %1455 = vmatprep.subr.bf16.mxu1 %v3998_v22 }
 0x34e   : > { %1456 = vmatpush1.bf16.msra.mxu1 %v3996_v23 }
 0x34f   : > { %1457 = vmatprep.subr.bf16.mxu1 %v4001_v24 }
 0x352   : > { %1458 = vmatpush1.bf16.msra.mxu1 %v3999_v25 }
 0x353   : > { %1459 = vmatprep.subr.bf16.mxu1 %v4004_v26 }
 0x356   : > { %1460 = vmatpush1.bf16.msra.mxu1 %v4002_v27 }
 0x357   : > { %1461 = vmatprep.subr.bf16.mxu1 %v4007_v28 }
 0x35a   : > { %1462 = vmatpush1.bf16.msra.mxu1 %v4005_v29 }
 0x35b   : > { %3646 = vmatprep.subr.bf16.mxu1 %v4816_v30 }
 0x35d   : > { %1464 = vmatmul.mubr.bf16.vlgmr.msra.gmra.mrb[4].mxu1 %v5398_v33  ;;  %v889_v33 = vrot.slane %v876_v34, %v888_v32 }
 0x35e   : > { %3648 = vmatprep.mubr.msk.bf16.mxu1 %vm4817_vm4, %v4816_v30 }
 0x3f0   : > { %v1422_v41 = vpop.f32.mrb[0].mxu1  ;;  %v1508_v42 = vpop.f32.mrb[0].mxu0 }
 0x3f1   : > { %v1424_v47 = vpop.f32.mrb[1].mxu1  ;;  %v1510_v48 = vpop.f32.mrb[1].mxu0  ;;  %v1423_v51 = vadd.f32 %v1422_v41, %v881_v37  ;;  %v1509_v52 = vadd.f32 %v1508_v42, %v897_v40 }
 0x3f2   : > { %v1426_v49 = vpop.f32.mrb[2].mxu1  ;;  %v1512_v50 = vpop.f32.mrb[2].mxu0  ;;  %v1425_v57 = vadd.f32 %v1424_v47, %v885_v45  ;;  %v1511_v58 = vadd.f32 %v1510_v48, %v901_v46 }
 0x3f3   : > { %v1427_v53 = vadd.f32 %v1426_v49, %v881_v37  ;;  %v1513_v54 = vadd.f32 %v1512_v50, %v897_v40  ;;  %v1428_v55 = vpop.f32.mrb[3].mxu1  ;;  %v1514_v56 = vpop.f32.mrb[3].mxu0 }
 0x3f4   : > { %v1429_v59 = vadd.f32 %v1428_v55, %v885_v45  ;;  %v1515_v60 = vadd.f32 %v1514_v56, %v901_v46 }
 0x3f5   : > { %v1517_v61 = vpack.c.bf16 %v1427_v53, %v1423_v51  ;;  %v1521_v62 = vpack.c.bf16 %v1513_v54, %v1509_v52 }
 0x3f6   : > { %v1518_v63 = vpack.c.bf16 %v1429_v59, %v1425_v57  ;;  %v1522_v0 = vpack.c.bf16 %v1515_v60, %v1511_v58 }
 0x430   : > { %v1465_v38 = vpop.f32.mrb[4].mxu1 }
 0x431   : > { %v1467_v2 = vpop.f32.mrb[5].mxu1  ;;  %v1466_v4 = vadd.f32 %v1465_v38, %v889_v33 }
 0x432   : > { %v1469_v3 = vpop.f32.mrb[6].mxu1  ;;  %v1468_v7 = vadd.f32 %v1467_v2, %v893_v39 }
 0x433   : > { %v1470_v5 = vadd.f32 %v1469_v3, %v889_v33  ;;  %v1471_v6 = vpop.f32.mrb[7].mxu1 }
 0x434   : > { %v1472_v8 = vadd.f32 %v1471_v6, %v893_v39 }
 0x435   : > { %v1519_v9 = vpack.c.bf16 %v1470_v5, %v1466_v4  ;;  %v4008_v5 = vld [vmem:[#allocation11] ss:$8 sps:$4 sm:$0xff]  }
 0x436   : > { %v1520_v10 = vpack.c.bf16 %v1472_v8, %v1468_v7  ;;  %v4013_v7 = vld [vmem:[#allocation11 + $0x14] ss:$8 sps:$4 sm:$0xff]  }
 0x437   : > { %3635 = vmatpush3.bf16.xpose.msra.mxu0 %v1519_v9 }
 0x438   : > { %3647 = vmatpush3.bf16.xpose.msra.mxu1 %v1520_v10  ;;  %3640 = vmatprep.subr.bf16.mxu0 %v4816_v30 }
 0x439   : > { %3652 = vmatprep.subr.bf16.mxu1 %v4816_v30 }
 0x43e   : > { %3637 = vmatmul.mubr.bf16.vlgmr.msra.gmra.mrb[4].mxu0 %v1517_v61  ;;  %v4010_v61 = vld [vmem:[#allocation11 + $0x4] ss:$8 sps:$4 sm:$0xff]  }
 0x43f   : > { %3641 = vmatpush3.bf16.msra.mxu0 %v1521_v62  ;;  %3649 = vmatmul.mubr.bf16.vlgmr.msra.gmra.mrb[8].mxu1 %v1518_v63 }
 0x440   : > { %3653 = vmatpush3.bf16.msra.mxu1 %v1522_v0  ;;  %3654 = vmatprep.mubr.msk.bf16.mxu1 %vm4817_vm4, %v4816_v30 }
 0x441   : > { %3642 = vmatprep.mubr.msk.bf16.mxu0 %vm4817_vm4, %v4816_v30  ;;  %1970 = vmatprep.subr.bf16.mxu1 %v4010_v61 }
 0x511   : > { %v1559_v13 = vpop.f32.mrb[4].mxu0 }
 0x512   : > { %v3638_v15 = vpop.f32.mrb[5].mxu0  ;;  %v1680_v16 = vpop.f32.mrb[8].mxu1  ;;  %v1566_v17 = vmul.f32 0.088388346, %v1559_v13  ;;  %v4016_v13 = vld [vmem:[#allocation11 + $0x24] ss:$8 sps:$4 sm:$0xff]  }
 0x513   : > { %v1687_v18 = vmul.f32 0.088388346, %v1680_v16  ;;  %v1562_v19 = vpop.f32.mrb[6].mxu0  ;;  %v3650_v20 = vpop.f32.mrb[9].mxu1  ;;  %v4019_v15 = vld [vmem:[#allocation11 + $0x34] ss:$8 sps:$4 sm:$0xff]  }
 0x514   : > { %v3639_v21 = vpop.f32.mrb[7].mxu0  ;;  %v1683_v22 = vpop.f32.mrb[10].mxu1  ;;  %v1567_v23 = vmul.f32 0.088388346, %v1562_v19  ;;  %v1574_v29 = vadd.f32 %v1572_v14, %v1566_v17  ;;  %v4017_v16 = vld [vmem:[#allocation11 + $0x30] ss:$8 sps:$4 sm:$0xff]  }
 0x515   : > { %v1688_v24 = vmul.f32 0.088388346, %v1683_v22  ;;  %v3651_v25 = vpop.f32.mrb[11].mxu1  ;;  %v1689_v26 = vadd.f32 %v1687_v18, %v1572_v14  ;;  %v4022_v17 = vld [vmem:[#allocation11 + $0x44] ss:$8 sps:$4 sm:$0xff]  }
 0x516   : > { %v1575_v31 = vadd.f32 %v1572_v14, %v1567_v23  ;;  %v1577_v34 = vsel %vm1576_vm6, %v1574_v29, -inf  ;;  %v4020_v18 = vld [vmem:[#allocation11 + $0x40] ss:$8 sps:$4 sm:$0xff]   ;;  %v4025_v19 = vld [vmem:[#allocation11 + $0x54] ss:$8 sps:$4 sm:$0xff]  }
 0x517   : > { %v1691_v27 = vsel %vm1576_vm6, %v1689_v26, -inf  ;;  %v1690_v28 = vadd.f32 %v1688_v24, %v1572_v14  ;;  %v4014_v14 = vld [vmem:[#allocation11 + $0x20] ss:$8 sps:$4 sm:$0xff]   ;;  %v4023_v20 = vld [vmem:[#allocation11 + $0x50] ss:$8 sps:$4 sm:$0xff]  }
 0x518   : > { %1692 = vmax.xlane.f32.xlu0 %v1691_v27  ;;  %v1580_v35 = vsel %vm1576_vm6, %v1575_v31, -inf  ;;  %v4028_v21 = vld [vmem:[#allocation11 + $0x64] ss:$8 sps:$4 sm:$0xff]   ;;  %v4026_v22 = vld [vmem:[#allocation11 + $0x60] ss:$8 sps:$4 sm:$0xff]  }
 0x519   : > { %v1694_v30 = vsel %vm1576_vm6, %v1690_v28, -inf  ;;  %v4031_v23 = vld [vmem:[#allocation11 + $0x74] ss:$8 sps:$4 sm:$0xff]   ;;  %v4029_v24 = vld [vmem:[#allocation11 + $0x70] ss:$8 sps:$4 sm:$0xff]  }
 0x51a   : > { %1695 = vmax.xlane.f32.xlu1 %v1694_v30  ;;  %v4034_v25 = vld [vmem:[#allocation11 + $0x84] ss:$8 sps:$4 sm:$0xff]   ;;  %v4037_v27 = vld [vmem:[#allocation11 + $0x94] ss:$8 sps:$4 sm:$0xff]   ;;  %v4038_v30 = vld [vmem:[#allocation11 + $0xa0] ss:$8 sps:$4 sm:$0xff]  }
 0x51c   : > { %1578 = vmax.xlane.f32.xlu0 %v1577_v34  ;;  %v4041_v34 = vld [vmem:[#allocation11 + $0xb0] ss:$8 sps:$4 sm:$0xff]  }
 0x51e   : > { %1581 = vmax.xlane.f32.xlu1 %v1580_v35  ;;  %v4046_v35 = vld [vmem:[#allocation11 + $0xc4] ss:$8 sps:$4 sm:$0xff]  }
 0x5a5   : > { %v1693_v37 = vpop.xlane.xlu0 %1692 }
 0x5a6   : > { %v1697_v40 = vsub.f32 %v1689_v26, %v1693_v37  ;;  %v4032_v26 = vld [vmem:[#allocation11 + $0x80] ss:$8 sps:$4 sm:$0xff]  }
 0x5a7   : > { %v1696_v41 = vpop.xlane.xlu1 %1695  ;;  %v4044_v37 = vld [vmem:[#allocation11 + $0xc0] ss:$8 sps:$4 sm:$0xff]  }
 0x5a8   : > { %v1699_v42 = vmul.f32 1.442695, %v1697_v40  ;;  %v1698_v45 = vsub.f32 %v1690_v28, %v1696_v41  ;;  %v4035_v28 = vld [vmem:[#allocation11 + $0x90] ss:$8 sps:$4 sm:$0xff]   ;;  %v4049_v40 = vld [vmem:[#allocation11 + $0xd4] ss:$8 sps:$4 sm:$0xff]  }
 0x5a9   : > { %v1579_v46 = vpop.xlane.xlu0 %1578  ;;  %v4047_v41 = vld [vmem:[#allocation11 + $0xd0] ss:$8 sps:$4 sm:$0xff]  }
 0x5aa   : > { %4256 = vpow2.f32 %v1699_v42  ;;  %v1701_v47 = vmul.f32 1.442695, %v1698_v45  ;;  %v1583_v48 = vsub.f32 %v1574_v29, %v1579_v46  ;;  %v4040_v29 = vld [vmem:[#allocation11 + $0xa4] ss:$8 sps:$4 sm:$0xff]   ;;  %v4050_v45 = vld [vmem:[#allocation11 + $0xe0] ss:$8 sps:$4 sm:$0xff]  }
 0x5ab   : > { %v1582_v49 = vpop.xlane.xlu1 %1581  ;;  %v4052_v42 = vld [vmem:[#allocation11 + $0xe4] ss:$8 sps:$4 sm:$0xff]   ;;  %v4055_v46 = vld [vmem:[#allocation11 + $0xf4] ss:$8 sps:$4 sm:$0xff]  }
 0x5ac   : > { %4258 = vpow2.f32 %v1701_v47  ;;  %v1585_v50 = vmul.f32 1.442695, %v1583_v48  ;;  %v1584_v51 = vsub.f32 %v1575_v31, %v1582_v49  ;;  %v4043_v31 = vld [vmem:[#allocation11 + $0xb4] ss:$8 sps:$4 sm:$0xff]   ;;  %v4053_v47 = vld [vmem:[#allocation11 + $0xf0] ss:$8 sps:$4 sm:$0xff]  }
 0x5ae   : > { %4260 = vpow2.f32 %v1585_v50  ;;  %v1587_v52 = vmul.f32 1.442695, %v1584_v51 }
 0x5b0   : > { %4262 = vpow2.f32 %v1587_v52 }
 0x5b4   : > { %v4257_v53 = vpop.eup %4256 }
 0x5b5   : > { %v1703_v54 = vsel %vm1576_vm6, %v4257_v53, 0.0 }
 0x5b6   : > { %v4259_v55 = vpop.eup %4258  ;;  %1704 = vadd.xlane.f32.xlu0 %v1703_v54 }
 0x5b7   : > { %v1706_v56 = vsel %vm1576_vm6, %v4259_v55, 0.0 }
 0x5b8   : > { %v4261_v57 = vpop.eup %4260  ;;  %1707 = vadd.xlane.f32.xlu1 %v1706_v56 }
 0x5b9   : > { %v1589_v58 = vsel %vm1576_vm6, %v4261_v57, 0.0 }
 0x5ba   : > { %v4263_v59 = vpop.eup %4262  ;;  %1590 = vadd.xlane.f32.xlu0 %v1589_v58  ;;  %v1798_v58 = vld [vmem:[#allocation12] sm:$0x3] }
 0x5bb   : > { %v1592_v60 = vsel %vm1576_vm6, %v4263_v59, 0.0 }
 0x5bc   : > { %1593 = vadd.xlane.f32.xlu1 %v1592_v60  ;;  %v1807_v60 = vrot.slane %v1798_v58, %v5388_v44 }
 0x643   : > { %v1705_v62 = vpop.xlane.xlu0 %1704 }
 0x644   : > { %4264 = vrcp.f32 %v1705_v62 }
 0x645   : > { %v1708_v63 = vpop.xlane.xlu1 %1707 }
 0x646   : > { %4266 = vrcp.f32 %v1708_v63 }
 0x647   : > { %v1591_v0 = vpop.xlane.xlu0 %1590 }
 0x648   : > { %4268 = vrcp.f32 %v1591_v0 }
 0x649   : > { %v1594_v33 = vpop.xlane.xlu1 %1593 }
 0x64a   : > { %4270 = vrcp.f32 %v1594_v33 }
 0x64e   : > { %v4265_v38 = vpop.eup %4264 }
 0x64f   : > { %v1711_v2 = vmul.f32 %v4265_v38, %v4257_v53  ;;  %v4280_v38 = vld [vmem:[%s5322_s22] sm:$0xff] }
 0x650   : > { %v4267_v39 = vpop.eup %4266 }
 0x651   : > { %v1712_v3 = vmul.f32 %v4267_v39, %v4259_v55 }
 0x652   : > { %v4269_v4 = vpop.eup %4268 }
 0x653   : > { %v1713_v6 = vpack.c.bf16 %v1712_v3, %v1711_v2  ;;  %v1597_v9 = vmul.f32 %v4269_v4, %v4261_v57  ;;  %v4281_v4 = vld [vmem:[%s5322_s22 + $0x8] sm:$0xff] }
 0x654   : > { %v4271_v8 = vpop.eup %4270 }
 0x655   : > { %v1598_v10 = vmul.f32 %v4271_v8, %v4263_v59  ;;  %3655 = vmatmul.mubr.msk.bf16.vlgmr.msra.gmra.mrb[12].mxu1 %vm1576_vm6, %v1713_v6  ;;  %v1803_v59 = vrot.slane %v1798_v58, %v5385_v43 }
 0x656   : > { %1971 = vmatpush1.bf16.msra.mxu1 %v4008_v5 }
 0x657   : > { %v1599_v12 = vpack.c.bf16 %v1598_v10, %v1597_v9  ;;  %1972 = vmatprep.subr.bf16.mxu1 %v4013_v7  ;;  %v4282_v7 = vld [vmem:[%s5322_s22 + $0x10] sm:$0xff]  ;;  %v4283_v9 = vld [vmem:[%s5322_s22 + $0x18] sm:$0xff]  ;;  %s4684_s22 = sshll.u32 %s4818_s28, 4  ;;  %s4685_s22 = int_to_ptr.vmem [resolvable:$false] %s4684_s22 }
 0x658   : > { %s4686_s5 = scalar_lea.vmem %s4685_s22, 1024  ;;  %p4687_p3 = scmp.lt.s32.totalorder %s5491_s0, %s4685_s22 }
 0x659   : > { %3643 = vmatmul.mubr.msk.bf16.vlgmr.msra.gmra.mrb[8].mxu0 %vm1576_vm6, %v1599_v12  ;;  %p4688_p11 = scmp.lt.s32.totalorder %s4686_s5, %s4680_s16 }
 0x65a   : > { %1973 = vmatpush1.bf16.msra.mxu1 %v4011_v11 }
 0x65b   : > { %1974 = vmatprep.subr.bf16.mxu1 %v4016_v13  ;;  %v4056_v13 = vld [vmem:[#allocation20] ss:$16 sps:$4 sm:$0xff]   ;;  %p4689_p6 = por %p4688_p11, %p4687_p3 }
 0x65d   : > { %p4690_p13 = pnand %p4689_p6, %p4683_p8 }
 0x65e   : > { %1975 = vmatpush1.bf16.msra.mxu1 %v4014_v14  ;;  %v4058_v14 = vld [vmem:[#allocation20 + $0x4] ss:$16 sps:$4 sm:$0xff]  }
 0x65f   : > { %1976 = vmatprep.subr.bf16.mxu1 %v4019_v15  ;;  %v4059_v15 = vld [vmem:[#allocation20 + $0x8] ss:$16 sps:$4 sm:$0xff]   ;;  %2503 = vmatprep.subr.bf16.mxu0 %v4058_v14  ;;  %v4116_v14 = vld [vmem:[#allocation20 + $0x140] ss:$16 sps:$4 sm:$0xff]  }
 0x660   : > { %2504 = vmatpush1.bf16.msra.mxu0 %v4056_v13  ;;  %v4121_v13 = vld [vmem:[#allocation20 + $0x14c] ss:$16 sps:$4 sm:$0xff]  }
 0x662   : > { %1977 = vmatpush1.bf16.msra.mxu1 %v4017_v16  ;;  %v4061_v16 = vld [vmem:[#allocation20 + $0xc] ss:$16 sps:$4 sm:$0xff]  }
 0x663   : > { %1978 = vmatprep.subr.bf16.mxu1 %v4022_v17  ;;  %v4064_v17 = vld [vmem:[#allocation20 + $0x24] ss:$16 sps:$4 sm:$0xff]  }
 0x664   : > { %2505 = vmatprep.subr.bf16.mxu0 %v4064_v17  ;;  %v4124_v17 = vld [vmem:[#allocation20 + $0x164] ss:$16 sps:$4 sm:$0xff]  }
 0x666   : > { %1979 = vmatpush1.bf16.msra.mxu1 %v4020_v18  ;;  %v4067_v18 = vld [vmem:[#allocation20 + $0x2c] ss:$16 sps:$4 sm:$0xff]  }
 0x667   : > { %1980 = vmatprep.subr.bf16.mxu1 %v4025_v19  ;;  %v4062_v19 = vld [vmem:[#allocation20 + $0x20] ss:$16 sps:$4 sm:$0xff]  }
 0x668   : > { %2506 = vmatpush1.bf16.msra.mxu0 %v4062_v19  ;;  %v4127_v19 = vld [vmem:[#allocation20 + $0x16c] ss:$16 sps:$4 sm:$0xff]  }
 0x66a   : > { %1981 = vmatpush1.bf16.msra.mxu1 %v4023_v20  ;;  %v4065_v20 = vld [vmem:[#allocation20 + $0x28] ss:$16 sps:$4 sm:$0xff]  }
 0x66b   : > { %1982 = vmatprep.subr.bf16.mxu1 %v4028_v21  ;;  %v4070_v21 = vld [vmem:[#allocation20 + $0x44] ss:$16 sps:$4 sm:$0xff]  }
 0x66c   : > { %2507 = vmatprep.subr.bf16.mxu0 %v4070_v21  ;;  %v4133_v21 = vld [vmem:[#allocation20 + $0x18c] ss:$16 sps:$4 sm:$0xff]  }
 0x66e   : > { %1983 = vmatpush1.bf16.msra.mxu1 %v4026_v22  ;;  %v4073_v22 = vld [vmem:[#allocation20 + $0x4c] ss:$16 sps:$4 sm:$0xff]  }
 0x66f   : > { %1984 = vmatprep.subr.bf16.mxu1 %v4031_v23  ;;  %v4068_v23 = vld [vmem:[#allocation20 + $0x40] ss:$16 sps:$4 sm:$0xff]  }
 0x670   : > { %2508 = vmatpush1.bf16.msra.mxu0 %v4068_v23  ;;  %v4131_v23 = vld [vmem:[#allocation20 + $0x188] ss:$16 sps:$4 sm:$0xff]  }
 0x672   : > { %1985 = vmatpush1.bf16.msra.mxu1 %v4029_v24  ;;  %v4071_v24 = vld [vmem:[#allocation20 + $0x48] ss:$16 sps:$4 sm:$0xff]  }
 0x673   : > { %1986 = vmatprep.subr.bf16.mxu1 %v4034_v25  ;;  %v4076_v25 = vld [vmem:[#allocation20 + $0x64] ss:$16 sps:$4 sm:$0xff]  }
 0x674   : > { %2509 = vmatprep.subr.bf16.mxu0 %v4076_v25  ;;  %v4139_v25 = vld [vmem:[#allocation20 + $0x1ac] ss:$16 sps:$4 sm:$0xff]  }
 0x676   : > { %1987 = vmatpush1.bf16.msra.mxu1 %v4032_v26  ;;  %v4079_v26 = vld [vmem:[#allocation20 + $0x6c] ss:$16 sps:$4 sm:$0xff]  }
 0x677   : > { %1988 = vmatprep.subr.bf16.mxu1 %v4037_v27  ;;  %v4074_v27 = vld [vmem:[#allocation20 + $0x60] ss:$16 sps:$4 sm:$0xff]  }
 0x678   : > { %2510 = vmatpush1.bf16.msra.mxu0 %v4074_v27  ;;  %v4137_v27 = vld [vmem:[#allocation20 + $0x1a8] ss:$16 sps:$4 sm:$0xff]  }
 0x67a   : > { %1989 = vmatpush1.bf16.msra.mxu1 %v4035_v28  ;;  %v4077_v28 = vld [vmem:[#allocation20 + $0x68] ss:$16 sps:$4 sm:$0xff]  }
 0x67b   : > { %1990 = vmatprep.subr.bf16.mxu1 %v4040_v29  ;;  %v4082_v29 = vld [vmem:[#allocation20 + $0x84] ss:$16 sps:$4 sm:$0xff]  }
 0x67c   : > { %2511 = vmatprep.subr.bf16.mxu0 %v4082_v29  ;;  %v4145_v29 = vld [vmem:[#allocation20 + $0x1cc] ss:$16 sps:$4 sm:$0xff]  }
 0x67e   : > { %1991 = vmatpush1.bf16.msra.mxu1 %v4038_v30  ;;  %v4085_v30 = vld [vmem:[#allocation20 + $0x8c] ss:$16 sps:$4 sm:$0xff]  }
 0x67f   : > { %1992 = vmatprep.subr.bf16.mxu1 %v4043_v31  ;;  %v4080_v31 = vld [vmem:[#allocation20 + $0x80] ss:$16 sps:$4 sm:$0xff]  }
 0x680   : > { %2512 = vmatpush1.bf16.msra.mxu0 %v4080_v31  ;;  %v4143_v31 = vld [vmem:[#allocation20 + $0x1c8] ss:$16 sps:$4 sm:$0xff]  }
 0x682   : > { %1993 = vmatpush1.bf16.msra.mxu1 %v4041_v34  ;;  %v4083_v34 = vld [vmem:[#allocation20 + $0x88] ss:$16 sps:$4 sm:$0xff]  }
 0x683   : > { %1994 = vmatprep.subr.bf16.mxu1 %v4046_v35  ;;  %v4088_v35 = vld [vmem:[#allocation20 + $0xa4] ss:$16 sps:$4 sm:$0xff]  }
 0x684   : > { %2513 = vmatprep.subr.bf16.mxu0 %v4088_v35  ;;  %v4151_v35 = vld [vmem:[#allocation20 + $0x1ec] ss:$16 sps:$4 sm:$0xff]  }
 0x686   : > { %1995 = vmatpush1.bf16.msra.mxu1 %v4044_v37  ;;  %v4091_v37 = vld [vmem:[#allocation20 + $0xac] ss:$16 sps:$4 sm:$0xff]  }
 0x687   : > { %1996 = vmatprep.subr.bf16.mxu1 %v4049_v40  ;;  %v4086_v40 = vld [vmem:[#allocation20 + $0xa0] ss:$16 sps:$4 sm:$0xff]  }
 0x688   : > { %2514 = vmatpush1.bf16.msra.mxu0 %v4086_v40  ;;  %v4149_v40 = vld [vmem:[#allocation20 + $0x1e8] ss:$16 sps:$4 sm:$0xff]  }
 0x68a   : > { %1997 = vmatpush1.bf16.msra.mxu1 %v4047_v41  ;;  %v4089_v41 = vld [vmem:[#allocation20 + $0xa8] ss:$16 sps:$4 sm:$0xff]  }
 0x68b   : > { %1998 = vmatprep.subr.bf16.mxu1 %v4052_v42  ;;  %v4094_v42 = vld [vmem:[#allocation20 + $0xc4] ss:$16 sps:$4 sm:$0xff]  }
 0x68c   : > { %2515 = vmatprep.subr.bf16.mxu0 %v4094_v42 }
 0x68e   : > { %1999 = vmatpush1.bf16.msra.mxu1 %v4050_v45  ;;  %v4097_v45 = vld [vmem:[#allocation20 + $0xcc] ss:$16 sps:$4 sm:$0xff]  }
 0x68f   : > { %2000 = vmatprep.subr.bf16.mxu1 %v4055_v46  ;;  %v4092_v46 = vld [vmem:[#allocation20 + $0xc0] ss:$16 sps:$4 sm:$0xff]  }
 0x690   : > { %2516 = vmatpush1.bf16.msra.mxu0 %v4092_v46 }
 0x692   : > { %2001 = vmatpush1.bf16.msra.mxu1 %v4053_v47  ;;  %v4095_v47 = vld [vmem:[#allocation20 + $0xc8] ss:$16 sps:$4 sm:$0xff]  }
 0x693   : > { %2546 = vmatprep.subr.bf16.mxu1 %v4061_v16  ;;  %v4122_v16 = vld [vmem:[#allocation20 + $0x160] ss:$16 sps:$4 sm:$0xff]  }
 0x728   : > { %v1751_v48 = vpop.f32.mrb[12].mxu1 }
 0x729   : > { %v3656_v49 = vpop.f32.mrb[13].mxu1 }
 0x72a   : > { %v1754_v50 = vpop.f32.mrb[14].mxu1 }
 0x72b   : > { %v1765_v51 = vpack.c.bf16 %v1754_v50, %v1751_v48  ;;  %v3657_v52 = vpop.f32.mrb[15].mxu1 }
 0x72c   : > { %v1637_v53 = vpop.f32.mrb[8].mxu0 }
 0x72d   : > { %v3644_v54 = vpop.f32.mrb[9].mxu0  ;;  %2002 = vmatprep.mubr.bf16.mxu1 %v1765_v51 }
 0x72e   : > { %v1640_v55 = vpop.f32.mrb[10].mxu0 }
 0x72f   : > { %v1764_v56 = vpack.c.bf16 %v1640_v55, %v1637_v53  ;;  %v3645_v57 = vpop.f32.mrb[11].mxu0 }
 0x731   : > { %2003 = vmatmul.mubr.bf16.vlgmr.msra.gmra.mrb[16].mxu1 %v1764_v56 }
 0x732   : > { %2547 = vmatpush1.bf16.msra.mxu1 %v4059_v15  ;;  %v4119_v15 = vld [vmem:[#allocation20 + $0x148] ss:$16 sps:$4 sm:$0xff]  }
 0x733   : > { %2548 = vmatprep.subr.bf16.mxu1 %v4067_v18  ;;  %v4125_v18 = vld [vmem:[#allocation20 + $0x168] ss:$16 sps:$4 sm:$0xff]  }
 0x736   : > { %2549 = vmatpush1.bf16.msra.mxu1 %v4065_v20  ;;  %v4130_v20 = vld [vmem:[#allocation20 + $0x184] ss:$16 sps:$4 sm:$0xff]  }
 0x737   : > { %2550 = vmatprep.subr.bf16.mxu1 %v4073_v22  ;;  %v4128_v22 = vld [vmem:[#allocation20 + $0x180] ss:$16 sps:$4 sm:$0xff]  }
 0x73a   : > { %2551 = vmatpush1.bf16.msra.mxu1 %v4071_v24  ;;  %v4136_v24 = vld [vmem:[#allocation20 + $0x1a4] ss:$16 sps:$4 sm:$0xff]  }
 0x73b   : > { %2552 = vmatprep.subr.bf16.mxu1 %v4079_v26  ;;  %v4134_v26 = vld [vmem:[#allocation20 + $0x1a0] ss:$16 sps:$4 sm:$0xff]  }
 0x73e   : > { %2553 = vmatpush1.bf16.msra.mxu1 %v4077_v28  ;;  %v4142_v28 = vld [vmem:[#allocation20 + $0x1c4] ss:$16 sps:$4 sm:$0xff]  }
 0x73f   : > { %2554 = vmatprep.subr.bf16.mxu1 %v4085_v30  ;;  %v4140_v30 = vld [vmem:[#allocation20 + $0x1c0] ss:$16 sps:$4 sm:$0xff]  }
 0x742   : > { %2555 = vmatpush1.bf16.msra.mxu1 %v4083_v34  ;;  %v4148_v34 = vld [vmem:[#allocation20 + $0x1e4] ss:$16 sps:$4 sm:$0xff]  }
 0x743   : > { %2556 = vmatprep.subr.bf16.mxu1 %v4091_v37  ;;  %v4146_v37 = vld [vmem:[#allocation20 + $0x1e0] ss:$16 sps:$4 sm:$0xff]  }
 0x746   : > { %2557 = vmatpush1.bf16.msra.mxu1 %v4089_v41  ;;  %v4154_v41 = vld [vmem:[#allocation23 + $0x4] ss:$8 sps:$4 sm:$0xff]  }
 0x747   : > { %2558 = vmatprep.subr.bf16.mxu1 %v4097_v45 }
 0x74a   : > { %2559 = vmatpush1.bf16.msra.mxu1 %v4095_v47 }
 0x804   : > { %v2004_v61 = vpop.f32.mrb[16].mxu1 }
 0x805   : > { %v2005_v62 = vadd.f32 %v2004_v61, %v1803_v59  ;;  %v2006_v63 = vpop.f32.mrb[17].mxu1 }
 0x806   : > { %v2007_v0 = vadd.f32 %v2006_v63, %v1807_v60  ;;  %v2008_v33 = vpop.f32.mrb[18].mxu1  ;;  %v4103_v63 = vld [vmem:[#allocation20 + $0xec] ss:$16 sps:$4 sm:$0xff]  }
 0x807   : > { %v5433_v39 = vadd.f32 %v4280_v38, %v2005_v62  ;;  %v2009_v2 = vadd.f32 %v2008_v33, %v1803_v59  ;;  %v2010_v3 = vpop.f32.mrb[19].mxu1  ;;  %v4100_v62 = vld [vmem:[#allocation20 + $0xe4] ss:$16 sps:$4 sm:$0xff]   ;;  %v4101_v33 = vld [vmem:[#allocation20 + $0xe8] ss:$16 sps:$4 sm:$0xff]   ;;  %2560 = vmatprep.subr.bf16.mxu1 %v4103_v63 }
 0x808   : > { %v5436_v5 = vadd.f32 %v4281_v4, %v2007_v0  ;;  %v2011_v6 = vadd.f32 %v2010_v3, %v1807_v60  ;;  %v4098_v0 = vld [vmem:[#allocation20 + $0xe0] ss:$16 sps:$4 sm:$0xff]   ;;  %2517 = vmatprep.subr.bf16.mxu0 %v4100_v62  ;;  %2561 = vmatpush1.bf16.msra.mxu1 %v4101_v33  ;;  %v4106_v38 = vld [vmem:[#allocation20 + $0x104] ss:$16 sps:$4 sm:$0xff]   ;;  %v4107_v4 = vld [vmem:[#allocation20 + $0x108] ss:$16 sps:$4 sm:$0xff]  }
 0x809   : > { %v5439_v8 = vadd.f32 %v4282_v7, %v2009_v2  ;;  %2518 = vmatpush1.bf16.msra.mxu0 %v4098_v0  ;;  %v4109_v2 = vld [vmem:[#allocation20 + $0x10c] ss:$16 sps:$4 sm:$0xff]   ;;  %v4104_v3 = vld [vmem:[#allocation20 + $0x100] ss:$16 sps:$4 sm:$0xff]  }
 0x80a   : > { %v5442_v10 = vadd.f32 %v4283_v9, %v2011_v6  ;;  %v2019_v11 = vadd.f32 %v5436_v5, %v5433_v39  ;;  %2519 = vmatprep.subr.bf16.mxu0 %v4106_v38  ;;  %2562 = vmatprep.subr.bf16.mxu1 %v4109_v2  ;;  %v4112_v6 = vld [vmem:[#allocation20 + $0x124] ss:$16 sps:$4 sm:$0xff]   ;;  %v4115_v7 = vld [vmem:[#allocation20 + $0x12c] ss:$16 sps:$4 sm:$0xff]   ;;  %v4110_v9 = vld [vmem:[#allocation20 + $0x120] ss:$16 sps:$4 sm:$0xff]  }
 0x80b   : > { %v2017_v0 = vld [vmem:[#allocation17] sm:$0x3]  ;;  %v2018_v2 = vld [vmem:[#allocation18] sm:$0x3] }
 0x80c   : > { %2020 = vadd.xlane.f32.xlu0 %v2019_v11  ;;  %v2022_v12 = vadd.f32 %v5442_v10, %v5439_v8  ;;  %2563 = vmatpush1.bf16.msra.mxu1 %v4107_v4  ;;  %v4113_v11 = vld [vmem:[#allocation20 + $0x128] ss:$16 sps:$4 sm:$0xff]   ;;  %v2065_v33 = vrot.slane %v2017_v0, %v5385_v43  ;;  %v2069_v38 = vrot.slane %v2017_v0, %v5388_v44 }
 0x80d   : > { %2520 = vmatpush1.bf16.msra.mxu0 %v4104_v3  ;;  %2564 = vmatprep.subr.bf16.mxu1 %v4115_v7 }
 0x80e   : > { %2023 = vadd.xlane.f32.xlu1 %v2022_v12  ;;  %2521 = vmatprep.subr.bf16.mxu0 %v4112_v6  ;;  %v4118_v12 = vld [vmem:[#allocation20 + $0x144] ss:$16 sps:$4 sm:$0xff]  }
 0x810   : > { %2565 = vmatpush1.bf16.msra.mxu1 %v4113_v11  ;;  %v2084_v11 = vrot.slane %v2018_v2, %v5385_v43 }
 0x811   : > { %2522 = vmatpush1.bf16.msra.mxu0 %v4110_v9  ;;  %2566 = vmatprep.subr.bf16.mxu1 %v4121_v13 }
 0x812   : > { %2523 = vmatprep.subr.bf16.mxu0 %v4118_v12  ;;  %v2088_v12 = vrot.slane %v2018_v2, %v5388_v44 }
 0x814   : > { %2567 = vmatpush1.bf16.msra.mxu1 %v4119_v15 }
 0x815   : > { %2524 = vmatpush1.bf16.msra.mxu0 %v4116_v14  ;;  %2568 = vmatprep.subr.bf16.mxu1 %v4127_v19 }
 0x816   : > { %2525 = vmatprep.subr.bf16.mxu0 %v4124_v17 }
 0x818   : > { %2569 = vmatpush1.bf16.msra.mxu1 %v4125_v18 }
 0x819   : > { %2526 = vmatpush1.bf16.msra.mxu0 %v4122_v16  ;;  %2570 = vmatprep.subr.bf16.mxu1 %v4133_v21 }
 0x81a   : > { %2527 = vmatprep.subr.bf16.mxu0 %v4130_v20 }
 0x81c   : > { %2571 = vmatpush1.bf16.msra.mxu1 %v4131_v23  ;;  %v4157_v23 = vld [vmem:[#allocation23 + $0x14] ss:$8 sps:$4 sm:$0xff]  }
 0x81d   : > { %2528 = vmatpush1.bf16.msra.mxu0 %v4128_v22  ;;  %2572 = vmatprep.subr.bf16.mxu1 %v4139_v25  ;;  %v4152_v22 = vld [vmem:[#allocation23] ss:$8 sps:$4 sm:$0xff]   ;;  %v4163_v25 = vld [vmem:[#allocation23 + $0x34] ss:$8 sps:$4 sm:$0xff]  }
 0x81e   : > { %2529 = vmatprep.subr.bf16.mxu0 %v4136_v24  ;;  %v4158_v24 = vld [vmem:[#allocation23 + $0x20] ss:$8 sps:$4 sm:$0xff]  }
 0x820   : > { %2573 = vmatpush1.bf16.msra.mxu1 %v4137_v27  ;;  %v4166_v27 = vld [vmem:[#allocation23 + $0x44] ss:$8 sps:$4 sm:$0xff]  }
 0x821   : > { %2530 = vmatpush1.bf16.msra.mxu0 %v4134_v26  ;;  %2574 = vmatprep.subr.bf16.mxu1 %v4145_v29  ;;  %v4161_v26 = vld [vmem:[#allocation23 + $0x30] ss:$8 sps:$4 sm:$0xff]   ;;  %v4169_v29 = vld [vmem:[#allocation23 + $0x54] ss:$8 sps:$4 sm:$0xff]  }
 0x822   : > { %2531 = vmatprep.subr.bf16.mxu0 %v4142_v28  ;;  %v4164_v28 = vld [vmem:[#allocation23 + $0x40] ss:$8 sps:$4 sm:$0xff]  }
 0x824   : > { %2575 = vmatpush1.bf16.msra.mxu1 %v4143_v31  ;;  %v4172_v31 = vld [vmem:[#allocation23 + $0x64] ss:$8 sps:$4 sm:$0xff]  }
 0x825   : > { %2532 = vmatpush1.bf16.msra.mxu0 %v4140_v30  ;;  %2576 = vmatprep.subr.bf16.mxu1 %v4151_v35  ;;  %v4167_v30 = vld [vmem:[#allocation23 + $0x50] ss:$8 sps:$4 sm:$0xff]   ;;  %v4175_v35 = vld [vmem:[#allocation23 + $0x74] ss:$8 sps:$4 sm:$0xff]  }
 0x826   : > { %2533 = vmatprep.subr.bf16.mxu0 %v4148_v34  ;;  %v4170_v34 = vld [vmem:[#allocation23 + $0x60] ss:$8 sps:$4 sm:$0xff]  }
 0x828   : > { %2577 = vmatpush1.bf16.msra.mxu1 %v4149_v40  ;;  %v4178_v40 = vld [vmem:[#allocation23 + $0x84] ss:$8 sps:$4 sm:$0xff]  }
 0x829   : > { %2534 = vmatpush1.bf16.msra.mxu0 %v4146_v37  ;;  %v4173_v37 = vld [vmem:[#allocation23 + $0x70] ss:$8 sps:$4 sm:$0xff]  }
 0x82a   : > { %2997 = vmatprep.subr.bf16.mxu0 %v4154_v41  ;;  %v4176_v41 = vld [vmem:[#allocation23 + $0x80] ss:$8 sps:$4 sm:$0xff]  }
 0x899   : > { %v2021_v48 = vpop.xlane.xlu0 %2020 }
 0x89a   : > { %v2025_v49 = vmul.f32 0.00390625, %v2021_v48 }
 0x89b   : > { %v2024_v50 = vpop.xlane.xlu1 %2023 }
 0x89c   : > { %v5449_v51 = vsub.f32 %v5433_v39, %v2025_v49  ;;  %v5452_v52 = vsub.f32 %v5436_v5, %v2025_v49  ;;  %v2026_v53 = vmul.f32 0.00390625, %v2024_v50 }
 0x89e   : > { %v5455_v54 = vsub.f32 %v5439_v8, %v2026_v53  ;;  %v5458_v55 = vsub.f32 %v5442_v10, %v2026_v53  ;;  %v2031_v56 = vmul.f32 %v5449_v51, %v5449_v51  ;;  %v2032_v57 = vmul.f32 %v5452_v52, %v5452_v52 }
 0x89f   : > { %v2072_v3 = vmul.f32 %v2065_v33, %v5449_v51  ;;  %v2073_v4 = vmul.f32 %v2069_v38, %v5452_v52 }
 0x8a0   : > { %v2033_v58 = vmul.f32 %v5455_v54, %v5455_v54  ;;  %v2034_v59 = vmul.f32 %v5458_v55, %v5458_v55  ;;  %v2035_v60 = vadd.f32 %v2032_v57, %v2031_v56  ;;  %v2074_v7 = vmul.f32 %v2065_v33, %v5455_v54  ;;  %v4155_v54 = vld [vmem:[#allocation23 + $0x10] ss:$8 sps:$4 sm:$0xff]  }
 0x8a1   : > { %v2075_v9 = vmul.f32 %v2069_v38, %v5458_v55  ;;  %v4160_v55 = vld [vmem:[#allocation23 + $0x24] ss:$8 sps:$4 sm:$0xff]  }
 0x8a2   : > { %v2038_v61 = vadd.f32 %v2034_v59, %v2033_v58  ;;  %2036 = vadd.xlane.f32.xlu0 %v2035_v60 }
 0x8a4   : > { %2039 = vadd.xlane.f32.xlu1 %v2038_v61 }
 0x92f   : > { %v2037_v42 = vpop.xlane.xlu0 %2036 }
 0x930   : > { %v2041_v45 = vmul.f32 0.003921569, %v2037_v42  ;;  %v4181_v42 = vld [vmem:[#allocation23 + $0x94] ss:$8 sps:$4 sm:$0xff]  }
 0x931   : > { %v2040_v46 = vpop.xlane.xlu1 %2039 }
 0x932   : > { %v2042_v47 = vmul.f32 0.003921569, %v2040_v46  ;;  %4272 = vrsqrt.f32 %v2041_v45  ;;  %vm2045_vm7 = vcmp.eq.f32.partialorder %v2041_v45, inf  ;;  %v2048_v53 = vand.u32 2147483648, %v2041_v45  ;;  %v4184_v46 = vld [vmem:[#allocation23 + $0xa4] ss:$8 sps:$4 sm:$0xff]  }
 0x933   : > { %vm2047_vm8 = vcmp.eq.f32.partialorder %v2041_v45, 0.0 }
 0x934   : > { %4274 = vrsqrt.f32 %v2042_v47  ;;  %vm2052_vm9 = vcmp.eq.f32.partialorder %v2042_v47, inf  ;;  %v2055_v58 = vand.u32 2147483648, %v2042_v47  ;;  %vm2054_vm10 = vcmp.eq.f32.partialorder %v2042_v47, 0.0 }
 0x93c   : > { %v4273_v48 = vpop.eup %4272 }
 0x93d   : > { %v2044_v50 = vmul.f32 %v4273_v48, %v2041_v45  ;;  %v4187_v48 = vld [vmem:[#allocation23 + $0xb4] ss:$8 sps:$4 sm:$0xff]  }
 0x93e   : > { %v4275_v49 = vpop.eup %4274 }
 0x93f   : > { %v2051_v56 = vmul.f32 %v4275_v49, %v2042_v47  ;;  %v2046_v57 = vsel %vm2045_vm7, %v2041_v45, %v2044_v50  ;;  %v4179_v45 = vld [vmem:[#allocation23 + $0x90] ss:$8 sps:$4 sm:$0xff]   ;;  %v4190_v50 = vld [vmem:[#allocation23 + $0xc4] ss:$8 sps:$4 sm:$0xff]  }
 0x940   : > { %v2049_v60 = vsel %vm2047_vm8, %v2048_v53, %v2046_v57  ;;  %v4185_v49 = vld [vmem:[#allocation23 + $0xb0] ss:$8 sps:$4 sm:$0xff]   ;;  %v4188_v53 = vld [vmem:[#allocation23 + $0xc0] ss:$8 sps:$4 sm:$0xff]  }
 0x941   : > { %v2053_v59 = vsel %vm2052_vm9, %v2042_v47, %v2051_v56  ;;  %v2057_v62 = vadd.f32 1e-06, %v2049_v60  ;;  %v4182_v47 = vld [vmem:[#allocation23 + $0xa0] ss:$8 sps:$4 sm:$0xff]   ;;  %v4193_v56 = vld [vmem:[#allocation23 + $0xd4] ss:$8 sps:$4 sm:$0xff]  }
 0x942   : > { %v2056_v61 = vsel %vm2054_vm10, %v2055_v58, %v2053_v59  ;;  %v4191_v57 = vld [vmem:[#allocation23 + $0xd0] ss:$8 sps:$4 sm:$0xff]   ;;  %v4196_v58 = vld [vmem:[#allocation23 + $0xe4] ss:$8 sps:$4 sm:$0xff]   ;;  %v4194_v59 = vld [vmem:[#allocation23 + $0xe0] ss:$8 sps:$4 sm:$0xff]  }
 0x943   : > { %v2058_v63 = vadd.f32 1e-06, %v2056_v61  ;;  %4276 = vrcp.f32 %v2057_v62  ;;  %v4199_v60 = vld [vmem:[#allocation23 + $0xf4] ss:$8 sps:$4 sm:$0xff]   ;;  %v4197_v61 = vld [vmem:[#allocation23 + $0xf0] ss:$8 sps:$4 sm:$0xff]  }
 0x944   : > { %v4202_v62 = vld [vmem:[#allocation23 + $0x104] ss:$8 sps:$4 sm:$0xff]  }
 0x945   : > { %4278 = vrcp.f32 %v2058_v63  ;;  %v2161_v63 = vld [vmem:[#allocation21] sm:$0xf] }
 0x946   : > { %v2166_v0 = vrot.slane %v2161_v63, %v5385_v43  ;;  %v2174_v33 = vrot.slane %v2161_v63, %v888_v32  ;;  %v2170_v38 = vrot.slane %v2161_v63, %v5388_v44  ;;  %v2178_v2 = vrot.slane %v2161_v63, %v892_v1  ;;  %v4241_v63 = vld [vmem:[#allocation23 + $0x1d4] ss:$8 sps:$4 sm:$0xff]  }
 0x94d   : > { %v4277_v6 = vpop.eup %4276 }
 0x94e   : > { %v2077_v14 = vmul.f32 %v4277_v6, %v2073_v4  ;;  %v2076_v15 = vmul.f32 %v4277_v6, %v2072_v3 }
 0x94f   : > { %v4279_v13 = vpop.eup %4278 }
 0x950   : > { %v2079_v16 = vmul.f32 %v4279_v13, %v2075_v9  ;;  %v2078_v17 = vmul.f32 %v4279_v13, %v2074_v7  ;;  %v2092_v18 = vadd.f32 %v2088_v12, %v2077_v14  ;;  %v2091_v20 = vadd.f32 %v2084_v11, %v2076_v15 }
 0x952   : > { %v2094_v19 = vadd.f32 %v2088_v12, %v2079_v16  ;;  %v2093_v51 = vadd.f32 %v2084_v11, %v2078_v17 }
 0x954   : > { %v2096_v21 = vpack.c.bf16 %v2094_v19, %v2092_v18  ;;  %v2095_v52 = vpack.c.bf16 %v2093_v51, %v2091_v20 }
 0x956   : > { %2535 = vmatprep.mubr.bf16.mxu0 %v2096_v21  ;;  %2578 = vmatprep.mubr.bf16.mxu1 %v2096_v21 }
 0x957   : > { %2536 = vmatmul.mubr.bf16.vlgmr.msra.gmra.mrb[12].mxu0 %v2095_v52  ;;  %2579 = vmatmul.mubr.bf16.vlgmr.msra.gmra.mrb[20].mxu1 %v2095_v52 }
 0x958   : > { %2998 = vmatpush1.bf16.msra.mxu0 %v4152_v22 }
 0x959   : > { %2999 = vmatprep.subr.bf16.mxu0 %v4157_v23 }
 0x95c   : > { %3000 = vmatpush1.bf16.msra.mxu0 %v4155_v54 }
 0x95d   : > { %3001 = vmatprep.subr.bf16.mxu0 %v4160_v55 }
 0x960   : > { %3002 = vmatpush1.bf16.msra.mxu0 %v4158_v24 }
 0x961   : > { %3003 = vmatprep.subr.bf16.mxu0 %v4163_v25 }
 0x964   : > { %3004 = vmatpush1.bf16.msra.mxu0 %v4161_v26 }
 0x965   : > { %3005 = vmatprep.subr.bf16.mxu0 %v4166_v27  ;;  %v4200_v27 = vld [vmem:[#allocation23 + $0x100] ss:$8 sps:$4 sm:$0xff]  }
 0x968   : > { %3006 = vmatpush1.bf16.msra.mxu0 %v4164_v28  ;;  %v4205_v28 = vld [vmem:[#allocation23 + $0x114] ss:$8 sps:$4 sm:$0xff]  }
 0x969   : > { %3007 = vmatprep.subr.bf16.mxu0 %v4169_v29  ;;  %v4203_v29 = vld [vmem:[#allocation23 + $0x110] ss:$8 sps:$4 sm:$0xff]  }
 0x96c   : > { %3008 = vmatpush1.bf16.msra.mxu0 %v4167_v30  ;;  %v4208_v30 = vld [vmem:[#allocation23 + $0x124] ss:$8 sps:$4 sm:$0xff]  }
 0x96d   : > { %3009 = vmatprep.subr.bf16.mxu0 %v4172_v31  ;;  %v4206_v31 = vld [vmem:[#allocation23 + $0x120] ss:$8 sps:$4 sm:$0xff]  }
 0x970   : > { %3010 = vmatpush1.bf16.msra.mxu0 %v4170_v34  ;;  %v4211_v34 = vld [vmem:[#allocation23 + $0x134] ss:$8 sps:$4 sm:$0xff]  }
 0x971   : > { %3011 = vmatprep.subr.bf16.mxu0 %v4175_v35  ;;  %v4209_v35 = vld [vmem:[#allocation23 + $0x130] ss:$8 sps:$4 sm:$0xff]  }
 0x974   : > { %3012 = vmatpush1.bf16.msra.mxu0 %v4173_v37  ;;  %v4214_v37 = vld [vmem:[#allocation23 + $0x144] ss:$8 sps:$4 sm:$0xff]  }
 0x975   : > { %3013 = vmatprep.subr.bf16.mxu0 %v4178_v40  ;;  %v4212_v40 = vld [vmem:[#allocation23 + $0x140] ss:$8 sps:$4 sm:$0xff]  }
 0x978   : > { %3014 = vmatpush1.bf16.msra.mxu0 %v4176_v41  ;;  %v4217_v41 = vld [vmem:[#allocation23 + $0x154] ss:$8 sps:$4 sm:$0xff]  }
 0x979   : > { %3015 = vmatprep.subr.bf16.mxu0 %v4181_v42  ;;  %v4215_v42 = vld [vmem:[#allocation23 + $0x150] ss:$8 sps:$4 sm:$0xff]  }
 0x97c   : > { %3016 = vmatpush1.bf16.msra.mxu0 %v4179_v45  ;;  %v4220_v45 = vld [vmem:[#allocation23 + $0x164] ss:$8 sps:$4 sm:$0xff]  }
 0x97d   : > { %3017 = vmatprep.subr.bf16.mxu0 %v4184_v46  ;;  %v4218_v46 = vld [vmem:[#allocation23 + $0x160] ss:$8 sps:$4 sm:$0xff]  }
 0x980   : > { %3018 = vmatpush1.bf16.msra.mxu0 %v4182_v47  ;;  %v4223_v47 = vld [vmem:[#allocation23 + $0x174] ss:$8 sps:$4 sm:$0xff]  }
 0x981   : > { %3019 = vmatprep.subr.bf16.mxu0 %v4187_v48  ;;  %v4221_v48 = vld [vmem:[#allocation23 + $0x170] ss:$8 sps:$4 sm:$0xff]  }
 0x984   : > { %3020 = vmatpush1.bf16.msra.mxu0 %v4185_v49  ;;  %v4226_v49 = vld [vmem:[#allocation23 + $0x184] ss:$8 sps:$4 sm:$0xff]  }
 0x985   : > { %3021 = vmatprep.subr.bf16.mxu0 %v4190_v50  ;;  %v4224_v50 = vld [vmem:[#allocation23 + $0x180] ss:$8 sps:$4 sm:$0xff]  }
 0x988   : > { %3022 = vmatpush1.bf16.msra.mxu0 %v4188_v53  ;;  %v4229_v53 = vld [vmem:[#allocation23 + $0x194] ss:$8 sps:$4 sm:$0xff]  }
 0x989   : > { %3023 = vmatprep.subr.bf16.mxu0 %v4193_v56  ;;  %v4227_v56 = vld [vmem:[#allocation23 + $0x190] ss:$8 sps:$4 sm:$0xff]  }
 0x98c   : > { %3024 = vmatpush1.bf16.msra.mxu0 %v4191_v57  ;;  %v4232_v57 = vld [vmem:[#allocation23 + $0x1a4] ss:$8 sps:$4 sm:$0xff]  }
 0x98d   : > { %3025 = vmatprep.subr.bf16.mxu0 %v4196_v58  ;;  %v4230_v58 = vld [vmem:[#allocation23 + $0x1a0] ss:$8 sps:$4 sm:$0xff]  }
 0x990   : > { %3026 = vmatpush1.bf16.msra.mxu0 %v4194_v59  ;;  %v4235_v59 = vld [vmem:[#allocation23 + $0x1b4] ss:$8 sps:$4 sm:$0xff]  }
 0x991   : > { %3027 = vmatprep.subr.bf16.mxu0 %v4199_v60  ;;  %v4233_v60 = vld [vmem:[#allocation23 + $0x1b0] ss:$8 sps:$4 sm:$0xff]  }
 0x994   : > { %3028 = vmatpush1.bf16.msra.mxu0 %v4197_v61  ;;  %v4238_v61 = vld [vmem:[#allocation23 + $0x1c4] ss:$8 sps:$4 sm:$0xff]  }
 0x995   : > { %3040 = vmatprep.subr.bf16.mxu0 %v4202_v62  ;;  %v4236_v62 = vld [vmem:[#allocation23 + $0x1c0] ss:$8 sps:$4 sm:$0xff]  }
 0xa2a   : > { %v2537_v3 = vpop.f32.mrb[12].mxu0  ;;  %v2580_v4 = vpop.f32.mrb[20].mxu1 }
 0xa2b   : > { %v2538_v6 = vadd.f32 %v2537_v3, %v2166_v0  ;;  %v2581_v7 = vadd.f32 %v2580_v4, %v2174_v33  ;;  %v2539_v9 = vpop.f32.mrb[13].mxu0  ;;  %v2582_v11 = vpop.f32.mrb[21].mxu1  ;;  %v4245_v3 = vld [vmem:[#allocation23 + $0x1f0] ss:$8 sps:$4 sm:$0xff]   ;;  %v2665_v4 = vld [vmem:[#allocation24] sm:$0x3] }
 0xa2c   : > { %v2540_v12 = vadd.f32 %v2539_v9, %v2170_v38  ;;  %v2583_v13 = vadd.f32 %v2582_v11, %v2178_v2  ;;  %v2541_v14 = vpop.f32.mrb[14].mxu0  ;;  %v2584_v15 = vpop.f32.mrb[22].mxu1 }
 0xa2d   : > { %v2542_v16 = vadd.f32 %v2541_v14, %v2166_v0  ;;  %v2585_v17 = vadd.f32 %v2584_v15, %v2174_v33  ;;  %v2543_v18 = vpop.f32.mrb[15].mxu0  ;;  %v2586_v19 = vpop.f32.mrb[23].mxu1  ;;  %v2589_v51 = vmax.f32 %v2538_v6, 0.0  ;;  %v2591_v21 = vmax.f32 %v2581_v7, 0.0  ;;  %v4239_v0 = vld [vmem:[#allocation23 + $0x1d0] ss:$8 sps:$4 sm:$0xff]  }
 0xa2e   : > { %v2544_v32 = vadd.f32 %v2543_v18, %v2170_v38  ;;  %v2587_v20 = vadd.f32 %v2586_v19, %v2178_v2  ;;  %v2590_v52 = vmax.f32 %v2540_v12, 0.0  ;;  %v2592_v22 = vmax.f32 %v2583_v13, 0.0  ;;  %v4244_v33 = vld [vmem:[#allocation23 + $0x1e4] ss:$8 sps:$4 sm:$0xff]   ;;  %v4242_v38 = vld [vmem:[#allocation23 + $0x1e0] ss:$8 sps:$4 sm:$0xff]  }
 0xa2f   : > { %v2593_v36 = vmax.f32 %v2542_v16, 0.0  ;;  %v2595_v1 = vmax.f32 %v2585_v17, 0.0  ;;  %v4247_v2 = vld [vmem:[#allocation23 + $0x1f4] ss:$8 sps:$4 sm:$0xff]   ;;  %v2670_v6 = vrot.slane %v2665_v4, %v5385_v43  ;;  %v2674_v7 = vrot.slane %v2665_v4, %v5388_v44 }
 0xa30   : > { %v2594_v23 = vmax.f32 %v2544_v32, 0.0  ;;  %v2596_v54 = vmax.f32 %v2587_v20, 0.0 }
 0xa31   : > { %v2597_v55 = vpack.c.bf16 %v2593_v36, %v2589_v51  ;;  %v5482_v24 = vpack.c.bf16 %v2595_v1, %v2591_v21 }
 0xa32   : > { %v2598_v25 = vpack.c.bf16 %v2594_v23, %v2590_v52  ;;  %v2600_v26 = vpack.c.bf16 %v2596_v54, %v2592_v22 }
 0xa34   : > { %3029 = vmatprep.mubr.bf16.mxu0 %v2598_v25 }
 0xa35   : > { %3030 = vmatmul.mubr.bf16.vlgmr.msra.gmra.mrb[16].mxu0 %v2597_v55 }
 0xa36   : > { %3041 = vmatpush1.bf16.msra.mxu0 %v4200_v27  ;;  %3072 = vmatprep.mubr.bf16.mxu0 %v2600_v26 }
 0xa37   : > { %3042 = vmatprep.subr.bf16.mxu0 %v4205_v28 }
 0xa3a   : > { %3043 = vmatpush1.bf16.msra.mxu0 %v4203_v29 }
 0xa3b   : > { %3044 = vmatprep.subr.bf16.mxu0 %v4208_v30 }
 0xa3e   : > { %3045 = vmatpush1.bf16.msra.mxu0 %v4206_v31 }
 0xa3f   : > { %3046 = vmatprep.subr.bf16.mxu0 %v4211_v34 }
 0xa42   : > { %3047 = vmatpush1.bf16.msra.mxu0 %v4209_v35 }
 0xa43   : > { %3048 = vmatprep.subr.bf16.mxu0 %v4214_v37 }
 0xa46   : > { %3049 = vmatpush1.bf16.msra.mxu0 %v4212_v40 }
 0xa47   : > { %3050 = vmatprep.subr.bf16.mxu0 %v4217_v41 }
 0xa4a   : > { %3051 = vmatpush1.bf16.msra.mxu0 %v4215_v42 }
 0xa4b   : > { %3052 = vmatprep.subr.bf16.mxu0 %v4220_v45 }
 0xa4e   : > { %3053 = vmatpush1.bf16.msra.mxu0 %v4218_v46 }
 0xa4f   : > { %3054 = vmatprep.subr.bf16.mxu0 %v4223_v47 }
 0xa52   : > { %3055 = vmatpush1.bf16.msra.mxu0 %v4221_v48 }
 0xa53   : > { %3056 = vmatprep.subr.bf16.mxu0 %v4226_v49 }
 0xa56   : > { %3057 = vmatpush1.bf16.msra.mxu0 %v4224_v50 }
 0xa57   : > { %3058 = vmatprep.subr.bf16.mxu0 %v4229_v53 }
 0xa5a   : > { %3059 = vmatpush1.bf16.msra.mxu0 %v4227_v56 }
 0xa5b   : > { %3060 = vmatprep.subr.bf16.mxu0 %v4232_v57 }
 0xa5e   : > { %3061 = vmatpush1.bf16.msra.mxu0 %v4230_v58 }
 0xa5f   : > { %3062 = vmatprep.subr.bf16.mxu0 %v4235_v59 }
 0xa62   : > { %3063 = vmatpush1.bf16.msra.mxu0 %v4233_v60 }
 0xa63   : > { %3064 = vmatprep.subr.bf16.mxu0 %v4238_v61 }
 0xa66   : > { %3065 = vmatpush1.bf16.msra.mxu0 %v4236_v62 }
 0xa67   : > { %3066 = vmatprep.subr.bf16.mxu0 %v4241_v63 }
 0xa6a   : > { %3067 = vmatpush1.bf16.msra.mxu0 %v4239_v0 }
 0xa6b   : > { %3068 = vmatprep.subr.bf16.mxu0 %v4244_v33 }
 0xa6e   : > { %3069 = vmatpush1.bf16.msra.mxu0 %v4242_v38 }
 0xa6f   : > { %3070 = vmatprep.subr.bf16.mxu0 %v4247_v2 }
 0xa72   : > { %3071 = vmatpush1.bf16.msra.mxu0 %v4245_v3 }
 0xa75   : > { %3073 = vmatmul.mubr.bf16.vlgmr.msra.gmra.mrb[16].mxu0 %v5482_v24 }
 0xb48   : > { %v3074_v9 = vpop.f32.mrb[16].mxu0 }
 0xb49   : > { %v3658_v11 = vadd.f32 %v3074_v9, %v2670_v6  ;;  %v3076_v12 = vpop.f32.mrb[17].mxu0 }
 0xb4a   : > { %v3659_v13 = vadd.f32 %v3076_v12, %v2674_v7  ;;  %v3078_v14 = vpop.f32.mrb[18].mxu0 }
 0xb4b   : > { %v3083_v15 = vadd.f32 %v3658_v11, %v5433_v39  ;;  %v3660_v16 = vadd.f32 %v3078_v14, %v2670_v6  ;;  %v3080_v17 = vpop.f32.mrb[19].mxu0 }
 0xb4c   : > { %v3084_v43 = vadd.f32 %v3659_v13, %v5436_v5  ;;  %v3661_v44 = vadd.f32 %v3080_v17, %v2674_v7 }
 0xb4d   : > { %3087 = vst [vmem:[%s691_s23] sm:$0xff] %v3083_v15  ;;  %v3085_v18 = vadd.f32 %v3660_v16, %v5439_v8 }
 0xb4e   : > { %3088 = vst [vmem:[%s691_s23 + $0x8] sm:$0xff] %v3084_v43  ;;  %v3086_v39 = vadd.f32 %v3661_v44, %v5442_v10 }
 0xb4f   : > { %3089 = vst [vmem:[%s691_s23 + $0x10] sm:$0xff] %v3085_v18 }
 0xb50   : > { %3090 = vst [vmem:[%s691_s23 + $0x18] sm:$0xff] %v3086_v39 }
 0xb51   : > { %4693 = shalt.err (!%p4690_p13)
}
 0xb52   : > { %s4694_s7 = scalar_lea.hbm %s5498_s8, 512  ;;  %s4698_s19 = scalar_lea.hbm %s5639_s2, 1024 }
 0xb53   : > { %p4695_p4 = scmp.ne.s32.totalorder %s5498_s8, %s4694_s7  ;;  %p4699_p7 = scmp.lt.u32.totalorder %s5498_s8, %s5639_s2 }
 0xb54   : > { %p4700_p12 = scmp.lt.u32.totalorder %s4698_s19, %s4694_s7  ;;  %p4702_p10 = scmp.lt.u32.totalorder %s4694_s7, %s5498_s8 }
 0xb55   : > { %p4696_p9 = pnand %p4695_p4, %p5640_p1 }
 0xb56   : > { %p4701_p2 = por %p4700_p12, %p4699_p7 }
 0xb57   : > { %p4697_p0 = pneg %p4696_p9 }
 0xb58   : > { %p4703_p5 = por %p4702_p10, %p4701_p2 }
 0xb5a   : > { %p4704_p8 = pnand %p4703_p5, %p4697_p0 }
 0xb5c   : > { %4707 = shalt.err (!%p4704_p8)
}
 0xb5d   : > { %s4819_s4 = smov 256   ;;  %s4820_s6 = smov 16  }
 0xb5e   : > { %3718 = dma.vmem_to_hbm [thread:$0]  (%p5640_p1), %s5491_s0, 512, %s5498_s8, %s3092_s25, %s4819_s4, %s4819_s4, %s4820_s6  }
 0xb5f PF: > { %s5641_s30 = sld [smem:[#allocation37_spill]]  ;;  %p5642_p3 = scmp.ne.s32.totalorder %s5610_s27, 0 }
 0xb60   : > { %p5643_p11 = scmp.ge.s32.totalorder %s4794_s18, 2 }
 0xb62   : > { %p3765_p6 = pnand %p5643_p11, %p5642_p3 }
 0xb65   : > { %s3123_s16 = sand.u32 1, %s5641_s30  }
 0xb66   : > { %s3124_s28 = scalar_lea.sflag [#allocation5], %s3123_s16 }
 0xb67   : > { %4769 = dma.done.wait (!%p3765_p6), %s3124_s28, 512  }
 0xb68   : > { %4771 = vsyncadd (!%p3765_p6), %s3124_s28, 4294966784  ;;  %s39_s18 = sadd.s32 1, %s4794_s18   ;;  %s5644_s22 = sld [smem:[#allocation38_spill]] }
 0xb69   : > { %p36_p13 = scmp.ge.s32.totalorder %s39_s18, 4   ;;  %s5645_s5 = smov %s5228_s29 }
 0xb6a   : > { %s5647_s30 = smov %s4782_s15  ;;  %s5648_s15 = smov %s5645_s5 }
 0xb6b   : > { %s5649_s16 = smov %s4790_s17  ;;  %s5650_s17 = smov %s5652_s26 }
 0xb6c   :  { %38 = sbr.rel (!%p36_p13) target bundleno = 25 (0x19), region = 182 }
 0xb6e   : > { %s5646_s29 = smov %s5644_s22 }
 0xb73   :  { %3129 = vsyncpa [#allocation4], 1 }
 0xb74   :  { %3131 = vsyncpa [#allocation4 + $0x1], 1 }
 0xb75   :  { %3132 = vsyncpa [#allocation7], 1 }
 0xb76   :  { %3134 = vsyncpa [#allocation7 + $0x1], 1 }
 0xb77   :  { %3135 = vsyncpa [#allocation10], 1 }
 0xb78   :  { %3136 = vsyncpa [#allocation13], 1 }
 0xb79   :  { %3137 = vsyncpa [#allocation16], 1 }
 0xb7a   :  { %3138 = vsyncpa [#allocation19], 1 }
 0xb7b   :  { %3139 = vsyncpa [#allocation22], 1 }
 0xb7c   :  { %3140 = vsyncpa [#allocation25], 1 }
 0xb7d   :  { %3141 = vsyncpa [#allocation5], 1 }
 0xb7e   :  { %3143 = vsyncpa [#allocation5 + $0x1], 1 }

</bundles_post_ra>
